<compile_context>
chip_gen: v7x
topology: tpu7x:2x2x1
jax: 0.10.0
libtpu: 0.0.40
codegen_flags: <defaults>
</compile_context>

<pallas_src>
import jax
import jax.numpy as jnp
from jax.experimental import pallas as pl
from jax.experimental.pallas import tpu as pltpu


def _round_up(v, m):
    return (v + m - 1) // m * m


def _make_kernel(num_input, num_output, layer_dims):
    """Build the unrolled VPU kernel and return (kernel, packed_param_len)."""
    # Packing layout (must match pack_params): per layer, fan_out*fan_in
    # weights in W_pt[o, i] (row-major over o then i) order, then fan_out biases.
    offsets = []
    off = 0
    for fan_in, fan_out in layer_dims:
        offsets.append((off, off + fan_in * fan_out))
        off += fan_in * fan_out + fan_out
    total = off
    n_layers = len(layer_dims)

    def kernel(p_ref, xT_ref, oT_ref):
        # p_ref : (total,) f32 in SMEM  -- scalar-indexed weights & biases.
        # xT_ref: (num_input,  TILE_B) VMEM block, batch on lanes.
        # oT_ref: (num_output, TILE_B) VMEM block, batch on lanes.
        rows = [xT_ref[i:i + 1, :] for i in range(num_input)]  # each (1, TILE_B)
        for li, ((fan_in, fan_out), (w_base, b_base)) in enumerate(
                zip(layer_dims, offsets)):
            new_rows = []
            for o in range(fan_out):
                # Scalar-weight x lane-vector FMA chain on the VPU.
                acc = rows[0] * p_ref[w_base + o * fan_in]
                for i in range(1, fan_in):
                    acc = acc + rows[i] * p_ref[w_base + o * fan_in + i]
                acc = acc + p_ref[b_base + o]
                if li < n_layers - 1:
                    acc = jnp.tanh(acc)          # EUP slot (free alongside VALU)
                new_rows.append(acc)
            rows = new_rows
        for o in range(num_output):
            oT_ref[o:o + 1, :] = rows[o]         # lane-dense stores

    return kernel, total


def pack_params(params):
    """Flatten [(W (in,out), b (1,out)), ...] into one f32 vector."""
    vals = []
    for w, b in params:
        vals.append(jnp.transpose(w).reshape(-1))   # W_pt[o, i] row-major
        vals.append(b.reshape(-1))
    return jnp.concatenate(vals).astype(jnp.float32)


def weiyang_net_forward(x, params):
    """x: (batch, num_input) f32. params: list of (W as (in, out), b as (1, out))."""
    batch, num_input = x.shape
    num_output = params[-1][0].shape[1]
    layer_dims = tuple((int(w.shape[0]), int(w.shape[1])) for w, _ in params)

    kernel, total = _make_kernel(num_input, num_output, layer_dims)
    packed = pack_params(params)
    assert packed.shape == (total,)

    # Batch tile: multiple of 128 (lane width); capped so tiles stay tiny even
    # against v7x's 64 MiB VMEM.
    tile_b = min(2048, _round_up(max(batch, 1), 128))
    b_pad = _round_up(batch, tile_b)

    # Host-side layout plumbing: batch onto the lane axis, pad to tile multiple.
    xT = x.astype(jnp.float32).T                      # (num_input, batch)
    if b_pad != batch:
        xT = jnp.pad(xT, ((0, 0), (0, b_pad - batch)))

    grid = (b_pad // tile_b,)

    oT = pl.pallas_call(
        kernel,
        out_shape=jax.ShapeDtypeStruct((num_output, b_pad), jnp.float32),
        grid=grid,
        in_specs=[
            pl.BlockSpec(memory_space=pltpu.MemorySpace.SMEM),    # packed W/b
            pl.BlockSpec((num_input, tile_b), lambda i: (0, i)),  # x^T tile
        ],
        out_specs=pl.BlockSpec((num_output, tile_b), lambda i: (0, i)),
        compiler_params=pltpu.CompilerParams(
            dimension_semantics=("parallel",)),       # both TCs on v7x
    )(packed, xT)

    return oT[:, :batch].T                            # (batch, num_output)


def init_params(key, num_input, num_hidden, num_output):
    """Deterministic init mimicking nn.Linear's U(-1/sqrt(in), 1/sqrt(in))."""
    assert num_hidden == 4, "weiyangNet is only shape-consistent with num_hidden == 4"
    layer_dims = [
        (num_input, num_hidden),   # layer1
        (4, 10),                   # layer3
        (10, 10),                  # layer5
        (10, 4),                   # layer7
        (num_hidden, num_output),  # layer9
    ]
    params = []
    for fan_in, fan_out in layer_dims:
        key, kw, kb = jax.random.split(key, 3)
        bound = 1.0 / (fan_in ** 0.5)
        w = jax.random.uniform(kw, (fan_in, fan_out), jnp.float32, -bound, bound)
        b = jax.random.uniform(kb, (1, fan_out), jnp.float32, -bound, bound)
        params.append((w, b))
    return params


def reference_forward(x, params):
    h = x
    for i, (w, b) in enumerate(params):
        h = h @ w + b
        if i < len(params) - 1:
            h = jnp.tanh(h)
    return h


if __name__ == "__main__":
    key = jax.random.PRNGKey(0)
    num_input, num_hidden, num_output = 2, 4, 1
    batch = 8

    kx, kp = jax.random.split(key)
    x = jax.random.normal(kx, (batch, num_input), jnp.float32)
    # Mirror the original script's `x / np.max(x)` normalization.
    x = x / jnp.max(x)

    params = init_params(kp, num_input, num_hidden, num_output)

    out = weiyang_net_forward(x, params)
    out = jax.block_until_ready(out)

    ref = reference_forward(x, params)
    assert out.shape == (batch, num_output)
    assert jnp.allclose(out, ref, atol=1e-5, rtol=1e-5)

    print("KERNEL_OK")
</pallas_src>

<mosaic_0001>
module attributes {stable_mosaic.version = 11 : i64} {
  func.func @kernel(%arg0: i32, %arg1: memref<221xf32, #tpu.memory_space<smem>>, %arg2: memref<2x128xf32, #tpu.memory_space<vmem>>, %arg3: memref<1x128xf32, #tpu.memory_space<vmem>>) attributes {dimension_semantics = [#tpu.dimension_semantics<parallel>], iteration_bounds = array<i64: 1>, scalar_prefetch = 0 : i64, scratch_operands = 0 : i64, tpu.core_type = #tpu.core_type<tc>, window_params = [{transform_indices = @transform_0, window_bounds = array<i64: 221>}, {transform_indices = @transform_1, window_bounds = array<i64: 2, 128>}, {transform_indices = @transform_2, window_bounds = array<i64: 1, 128>}]} {
    %c0 = arith.constant 0 : index
    %c0_0 = arith.constant 0 : index
    %0 = vector.load %arg2[%c0, %c0_0] : memref<2x128xf32, #tpu.memory_space<vmem>>, vector<1x128xf32>
    %c1 = arith.constant 1 : index
    %c0_1 = arith.constant 0 : index
    %1 = vector.load %arg2[%c1, %c0_1] : memref<2x128xf32, #tpu.memory_space<vmem>>, vector<1x128xf32>
    %c0_2 = arith.constant 0 : index
    %2 = memref.load %arg1[%c0_2] : memref<221xf32, #tpu.memory_space<smem>>
    %3 = vector.broadcast %2 : f32 to vector<1x128xf32>
    %4 = arith.mulf %0, %3 : vector<1x128xf32>
    %c1_3 = arith.constant 1 : index
    %5 = memref.load %arg1[%c1_3] : memref<221xf32, #tpu.memory_space<smem>>
    %6 = vector.broadcast %5 : f32 to vector<1x128xf32>
    %7 = arith.mulf %1, %6 : vector<1x128xf32>
    %8 = arith.addf %4, %7 : vector<1x128xf32>
    %c8 = arith.constant 8 : index
    %9 = memref.load %arg1[%c8] : memref<221xf32, #tpu.memory_space<smem>>
    %10 = vector.broadcast %9 : f32 to vector<1x128xf32>
    %11 = arith.addf %8, %10 : vector<1x128xf32>
    %12 = math.tanh %11 : vector<1x128xf32>
    %c2 = arith.constant 2 : index
    %13 = memref.load %arg1[%c2] : memref<221xf32, #tpu.memory_space<smem>>
    %14 = vector.broadcast %13 : f32 to vector<1x128xf32>
    %15 = arith.mulf %0, %14 : vector<1x128xf32>
    %c3 = arith.constant 3 : index
    %16 = memref.load %arg1[%c3] : memref<221xf32, #tpu.memory_space<smem>>
    %17 = vector.broadcast %16 : f32 to vector<1x128xf32>
    %18 = arith.mulf %1, %17 : vector<1x128xf32>
    %19 = arith.addf %15, %18 : vector<1x128xf32>
    %c9 = arith.constant 9 : index
    %20 = memref.load %arg1[%c9] : memref<221xf32, #tpu.memory_space<smem>>
    %21 = vector.broadcast %20 : f32 to vector<1x128xf32>
    %22 = arith.addf %19, %21 : vector<1x128xf32>
    %23 = math.tanh %22 : vector<1x128xf32>
    %c4 = arith.constant 4 : index
    %24 = memref.load %arg1[%c4] : memref<221xf32, #tpu.memory_space<smem>>
    %25 = vector.broadcast %24 : f32 to vector<1x128xf32>
    %26 = arith.mulf %0, %25 : vector<1x128xf32>
    %c5 = arith.constant 5 : index
    %27 = memref.load %arg1[%c5] : memref<221xf32, #tpu.memory_space<smem>>
    %28 = vector.broadcast %27 : f32 to vector<1x128xf32>
    %29 = arith.mulf %1, %28 : vector<1x128xf32>
    %30 = arith.addf %26, %29 : vector<1x128xf32>
    %c10 = arith.constant 10 : index
    %31 = memref.load %arg1[%c10] : memref<221xf32, #tpu.memory_space<smem>>
    %32 = vector.broadcast %31 : f32 to vector<1x128xf32>
    %33 = arith.addf %30, %32 : vector<1x128xf32>
    %34 = math.tanh %33 : vector<1x128xf32>
    %c6 = arith.constant 6 : index
    %35 = memref.load %arg1[%c6] : memref<221xf32, #tpu.memory_space<smem>>
    %36 = vector.broadcast %35 : f32 to vector<1x128xf32>
    %37 = arith.mulf %0, %36 : vector<1x128xf32>
    %c7 = arith.constant 7 : index
    %38 = memref.load %arg1[%c7] : memref<221xf32, #tpu.memory_space<smem>>
    %39 = vector.broadcast %38 : f32 to vector<1x128xf32>
    %40 = arith.mulf %1, %39 : vector<1x128xf32>
    %41 = arith.addf %37, %40 : vector<1x128xf32>
    %c11 = arith.constant 11 : index
    %42 = memref.load %arg1[%c11] : memref<221xf32, #tpu.memory_space<smem>>
    %43 = vector.broadcast %42 : f32 to vector<1x128xf32>
    %44 = arith.addf %41, %43 : vector<1x128xf32>
    %45 = math.tanh %44 : vector<1x128xf32>
    %c12 = arith.constant 12 : index
    %46 = memref.load %arg1[%c12] : memref<221xf32, #tpu.memory_space<smem>>
    %47 = vector.broadcast %46 : f32 to vector<1x128xf32>
    %48 = arith.mulf %12, %47 : vector<1x128xf32>
    %c13 = arith.constant 13 : index
    %49 = memref.load %arg1[%c13] : memref<221xf32, #tpu.memory_space<smem>>
    %50 = vector.broadcast %49 : f32 to vector<1x128xf32>
    %51 = arith.mulf %23, %50 : vector<1x128xf32>
    %52 = arith.addf %48, %51 : vector<1x128xf32>
    %c14 = arith.constant 14 : index
    %53 = memref.load %arg1[%c14] : memref<221xf32, #tpu.memory_space<smem>>
    %54 = vector.broadcast %53 : f32 to vector<1x128xf32>
    %55 = arith.mulf %34, %54 : vector<1x128xf32>
    %56 = arith.addf %52, %55 : vector<1x128xf32>
    %c15 = arith.constant 15 : index
    %57 = memref.load %arg1[%c15] : memref<221xf32, #tpu.memory_space<smem>>
    %58 = vector.broadcast %57 : f32 to vector<1x128xf32>
    %59 = arith.mulf %45, %58 : vector<1x128xf32>
    %60 = arith.addf %56, %59 : vector<1x128xf32>
    %c52 = arith.constant 52 : index
    %61 = memref.load %arg1[%c52] : memref<221xf32, #tpu.memory_space<smem>>
    %62 = vector.broadcast %61 : f32 to vector<1x128xf32>
    %63 = arith.addf %60, %62 : vector<1x128xf32>
    %64 = math.tanh %63 : vector<1x128xf32>
    %c16 = arith.constant 16 : index
    %65 = memref.load %arg1[%c16] : memref<221xf32, #tpu.memory_space<smem>>
    %66 = vector.broadcast %65 : f32 to vector<1x128xf32>
    %67 = arith.mulf %12, %66 : vector<1x128xf32>
    %c17 = arith.constant 17 : index
    %68 = memref.load %arg1[%c17] : memref<221xf32, #tpu.memory_space<smem>>
    %69 = vector.broadcast %68 : f32 to vector<1x128xf32>
    %70 = arith.mulf %23, %69 : vector<1x128xf32>
    %71 = arith.addf %67, %70 : vector<1x128xf32>
    %c18 = arith.constant 18 : index
    %72 = memref.load %arg1[%c18] : memref<221xf32, #tpu.memory_space<smem>>
    %73 = vector.broadcast %72 : f32 to vector<1x128xf32>
    %74 = arith.mulf %34, %73 : vector<1x128xf32>
    %75 = arith.addf %71, %74 : vector<1x128xf32>
    %c19 = arith.constant 19 : index
    %76 = memref.load %arg1[%c19] : memref<221xf32, #tpu.memory_space<smem>>
    %77 = vector.broadcast %76 : f32 to vector<1x128xf32>
    %78 = arith.mulf %45, %77 : vector<1x128xf32>
    %79 = arith.addf %75, %78 : vector<1x128xf32>
    %c53 = arith.constant 53 : index
    %80 = memref.load %arg1[%c53] : memref<221xf32, #tpu.memory_space<smem>>
    %81 = vector.broadcast %80 : f32 to vector<1x128xf32>
    %82 = arith.addf %79, %81 : vector<1x128xf32>
    %83 = math.tanh %82 : vector<1x128xf32>
    %c20 = arith.constant 20 : index
    %84 = memref.load %arg1[%c20] : memref<221xf32, #tpu.memory_space<smem>>
    %85 = vector.broadcast %84 : f32 to vector<1x128xf32>
    %86 = arith.mulf %12, %85 : vector<1x128xf32>
    %c21 = arith.constant 21 : index
    %87 = memref.load %arg1[%c21] : memref<221xf32, #tpu.memory_space<smem>>
    %88 = vector.broadcast %87 : f32 to vector<1x128xf32>
    %89 = arith.mulf %23, %88 : vector<1x128xf32>
    %90 = arith.addf %86, %89 : vector<1x128xf32>
    %c22 = arith.constant 22 : index
    %91 = memref.load %arg1[%c22] : memref<221xf32, #tpu.memory_space<smem>>
    %92 = vector.broadcast %91 : f32 to vector<1x128xf32>
    %93 = arith.mulf %34, %92 : vector<1x128xf32>
    %94 = arith.addf %90, %93 : vector<1x128xf32>
    %c23 = arith.constant 23 : index
    %95 = memref.load %arg1[%c23] : memref<221xf32, #tpu.memory_space<smem>>
    %96 = vector.broadcast %95 : f32 to vector<1x128xf32>
    %97 = arith.mulf %45, %96 : vector<1x128xf32>
    %98 = arith.addf %94, %97 : vector<1x128xf32>
    %c54 = arith.constant 54 : index
    %99 = memref.load %arg1[%c54] : memref<221xf32, #tpu.memory_space<smem>>
    %100 = vector.broadcast %99 : f32 to vector<1x128xf32>
    %101 = arith.addf %98, %100 : vector<1x128xf32>
    %102 = math.tanh %101 : vector<1x128xf32>
    %c24 = arith.constant 24 : index
    %103 = memref.load %arg1[%c24] : memref<221xf32, #tpu.memory_space<smem>>
    %104 = vector.broadcast %103 : f32 to vector<1x128xf32>
    %105 = arith.mulf %12, %104 : vector<1x128xf32>
    %c25 = arith.constant 25 : index
    %106 = memref.load %arg1[%c25] : memref<221xf32, #tpu.memory_space<smem>>
    %107 = vector.broadcast %106 : f32 to vector<1x128xf32>
    %108 = arith.mulf %23, %107 : vector<1x128xf32>
    %109 = arith.addf %105, %108 : vector<1x128xf32>
    %c26 = arith.constant 26 : index
    %110 = memref.load %arg1[%c26] : memref<221xf32, #tpu.memory_space<smem>>
    %111 = vector.broadcast %110 : f32 to vector<1x128xf32>
    %112 = arith.mulf %34, %111 : vector<1x128xf32>
    %113 = arith.addf %109, %112 : vector<1x128xf32>
    %c27 = arith.constant 27 : index
    %114 = memref.load %arg1[%c27] : memref<221xf32, #tpu.memory_space<smem>>
    %115 = vector.broadcast %114 : f32 to vector<1x128xf32>
    %116 = arith.mulf %45, %115 : vector<1x128xf32>
    %117 = arith.addf %113, %116 : vector<1x128xf32>
    %c55 = arith.constant 55 : index
    %118 = memref.load %arg1[%c55] : memref<221xf32, #tpu.memory_space<smem>>
    %119 = vector.broadcast %118 : f32 to vector<1x128xf32>
    %120 = arith.addf %117, %119 : vector<1x128xf32>
    %121 = math.tanh %120 : vector<1x128xf32>
    %c28 = arith.constant 28 : index
    %122 = memref.load %arg1[%c28] : memref<221xf32, #tpu.memory_space<smem>>
    %123 = vector.broadcast %122 : f32 to vector<1x128xf32>
    %124 = arith.mulf %12, %123 : vector<1x128xf32>
    %c29 = arith.constant 29 : index
    %125 = memref.load %arg1[%c29] : memref<221xf32, #tpu.memory_space<smem>>
    %126 = vector.broadcast %125 : f32 to vector<1x128xf32>
    %127 = arith.mulf %23, %126 : vector<1x128xf32>
    %128 = arith.addf %124, %127 : vector<1x128xf32>
    %c30 = arith.constant 30 : index
    %129 = memref.load %arg1[%c30] : memref<221xf32, #tpu.memory_space<smem>>
    %130 = vector.broadcast %129 : f32 to vector<1x128xf32>
    %131 = arith.mulf %34, %130 : vector<1x128xf32>
    %132 = arith.addf %128, %131 : vector<1x128xf32>
    %c31 = arith.constant 31 : index
    %133 = memref.load %arg1[%c31] : memref<221xf32, #tpu.memory_space<smem>>
    %134 = vector.broadcast %133 : f32 to vector<1x128xf32>
    %135 = arith.mulf %45, %134 : vector<1x128xf32>
    %136 = arith.addf %132, %135 : vector<1x128xf32>
    %c56 = arith.constant 56 : index
    %137 = memref.load %arg1[%c56] : memref<221xf32, #tpu.memory_space<smem>>
    %138 = vector.broadcast %137 : f32 to vector<1x128xf32>
    %139 = arith.addf %136, %138 : vector<1x128xf32>
    %140 = math.tanh %139 : vector<1x128xf32>
    %c32 = arith.constant 32 : index
    %141 = memref.load %arg1[%c32] : memref<221xf32, #tpu.memory_space<smem>>
    %142 = vector.broadcast %141 : f32 to vector<1x128xf32>
    %143 = arith.mulf %12, %142 : vector<1x128xf32>
    %c33 = arith.constant 33 : index
    %144 = memref.load %arg1[%c33] : memref<221xf32, #tpu.memory_space<smem>>
    %145 = vector.broadcast %144 : f32 to vector<1x128xf32>
    %146 = arith.mulf %23, %145 : vector<1x128xf32>
    %147 = arith.addf %143, %146 : vector<1x128xf32>
    %c34 = arith.constant 34 : index
    %148 = memref.load %arg1[%c34] : memref<221xf32, #tpu.memory_space<smem>>
    %149 = vector.broadcast %148 : f32 to vector<1x128xf32>
    %150 = arith.mulf %34, %149 : vector<1x128xf32>
    %151 = arith.addf %147, %150 : vector<1x128xf32>
    %c35 = arith.constant 35 : index
    %152 = memref.load %arg1[%c35] : memref<221xf32, #tpu.memory_space<smem>>
    %153 = vector.broadcast %152 : f32 to vector<1x128xf32>
    %154 = arith.mulf %45, %153 : vector<1x128xf32>
    %155 = arith.addf %151, %154 : vector<1x128xf32>
    %c57 = arith.constant 57 : index
    %156 = memref.load %arg1[%c57] : memref<221xf32, #tpu.memory_space<smem>>
    %157 = vector.broadcast %156 : f32 to vector<1x128xf32>
    %158 = arith.addf %155, %157 : vector<1x128xf32>
    %159 = math.tanh %158 : vector<1x128xf32>
    %c36 = arith.constant 36 : index
    %160 = memref.load %arg1[%c36] : memref<221xf32, #tpu.memory_space<smem>>
    %161 = vector.broadcast %160 : f32 to vector<1x128xf32>
    %162 = arith.mulf %12, %161 : vector<1x128xf32>
    %c37 = arith.constant 37 : index
    %163 = memref.load %arg1[%c37] : memref<221xf32, #tpu.memory_space<smem>>
    %164 = vector.broadcast %163 : f32 to vector<1x128xf32>
    %165 = arith.mulf %23, %164 : vector<1x128xf32>
    %166 = arith.addf %162, %165 : vector<1x128xf32>
    %c38 = arith.constant 38 : index
    %167 = memref.load %arg1[%c38] : memref<221xf32, #tpu.memory_space<smem>>
    %168 = vector.broadcast %167 : f32 to vector<1x128xf32>
    %169 = arith.mulf %34, %168 : vector<1x128xf32>
    %170 = arith.addf %166, %169 : vector<1x128xf32>
    %c39 = arith.constant 39 : index
    %171 = memref.load %arg1[%c39] : memref<221xf32, #tpu.memory_space<smem>>
    %172 = vector.broadcast %171 : f32 to vector<1x128xf32>
    %173 = arith.mulf %45, %172 : vector<1x128xf32>
    %174 = arith.addf %170, %173 : vector<1x128xf32>
    %c58 = arith.constant 58 : index
    %175 = memref.load %arg1[%c58] : memref<221xf32, #tpu.memory_space<smem>>
    %176 = vector.broadcast %175 : f32 to vector<1x128xf32>
    %177 = arith.addf %174, %176 : vector<1x128xf32>
    %178 = math.tanh %177 : vector<1x128xf32>
    %c40 = arith.constant 40 : index
    %179 = memref.load %arg1[%c40] : memref<221xf32, #tpu.memory_space<smem>>
    %180 = vector.broadcast %179 : f32 to vector<1x128xf32>
    %181 = arith.mulf %12, %180 : vector<1x128xf32>
    %c41 = arith.constant 41 : index
    %182 = memref.load %arg1[%c41] : memref<221xf32, #tpu.memory_space<smem>>
    %183 = vector.broadcast %182 : f32 to vector<1x128xf32>
    %184 = arith.mulf %23, %183 : vector<1x128xf32>
    %185 = arith.addf %181, %184 : vector<1x128xf32>
    %c42 = arith.constant 42 : index
    %186 = memref.load %arg1[%c42] : memref<221xf32, #tpu.memory_space<smem>>
    %187 = vector.broadcast %186 : f32 to vector<1x128xf32>
    %188 = arith.mulf %34, %187 : vector<1x128xf32>
    %189 = arith.addf %185, %188 : vector<1x128xf32>
    %c43 = arith.constant 43 : index
    %190 = memref.load %arg1[%c43] : memref<221xf32, #tpu.memory_space<smem>>
    %191 = vector.broadcast %190 : f32 to vector<1x128xf32>
    %192 = arith.mulf %45, %191 : vector<1x128xf32>
    %193 = arith.addf %189, %192 : vector<1x128xf32>
    %c59 = arith.constant 59 : index
    %194 = memref.load %arg1[%c59] : memref<221xf32, #tpu.memory_space<smem>>
    %195 = vector.broadcast %194 : f32 to vector<1x128xf32>
    %196 = arith.addf %193, %195 : vector<1x128xf32>
    %197 = math.tanh %196 : vector<1x128xf32>
    %c44 = arith.constant 44 : index
    %198 = memref.load %arg1[%c44] : memref<221xf32, #tpu.memory_space<smem>>
    %199 = vector.broadcast %198 : f32 to vector<1x128xf32>
    %200 = arith.mulf %12, %199 : vector<1x128xf32>
    %c45 = arith.constant 45 : index
    %201 = memref.load %arg1[%c45] : memref<221xf32, #tpu.memory_space<smem>>
    %202 = vector.broadcast %201 : f32 to vector<1x128xf32>
    %203 = arith.mulf %23, %202 : vector<1x128xf32>
    %204 = arith.addf %200, %203 : vector<1x128xf32>
    %c46 = arith.constant 46 : index
    %205 = memref.load %arg1[%c46] : memref<221xf32, #tpu.memory_space<smem>>
    %206 = vector.broadcast %205 : f32 to vector<1x128xf32>
    %207 = arith.mulf %34, %206 : vector<1x128xf32>
    %208 = arith.addf %204, %207 : vector<1x128xf32>
    %c47 = arith.constant 47 : index
    %209 = memref.load %arg1[%c47] : memref<221xf32, #tpu.memory_space<smem>>
    %210 = vector.broadcast %209 : f32 to vector<1x128xf32>
    %211 = arith.mulf %45, %210 : vector<1x128xf32>
    %212 = arith.addf %208, %211 : vector<1x128xf32>
    %c60 = arith.constant 60 : index
    %213 = memref.load %arg1[%c60] : memref<221xf32, #tpu.memory_space<smem>>
    %214 = vector.broadcast %213 : f32 to vector<1x128xf32>
    %215 = arith.addf %212, %214 : vector<1x128xf32>
    %216 = math.tanh %215 : vector<1x128xf32>
    %c48 = arith.constant 48 : index
    %217 = memref.load %arg1[%c48] : memref<221xf32, #tpu.memory_space<smem>>
    %218 = vector.broadcast %217 : f32 to vector<1x128xf32>
    %219 = arith.mulf %12, %218 : vector<1x128xf32>
    %c49 = arith.constant 49 : index
    %220 = memref.load %arg1[%c49] : memref<221xf32, #tpu.memory_space<smem>>
    %221 = vector.broadcast %220 : f32 to vector<1x128xf32>
    %222 = arith.mulf %23, %221 : vector<1x128xf32>
    %223 = arith.addf %219, %222 : vector<1x128xf32>
    %c50 = arith.constant 50 : index
    %224 = memref.load %arg1[%c50] : memref<221xf32, #tpu.memory_space<smem>>
    %225 = vector.broadcast %224 : f32 to vector<1x128xf32>
    %226 = arith.mulf %34, %225 : vector<1x128xf32>
    %227 = arith.addf %223, %226 : vector<1x128xf32>
    %c51 = arith.constant 51 : index
    %228 = memref.load %arg1[%c51] : memref<221xf32, #tpu.memory_space<smem>>
    %229 = vector.broadcast %228 : f32 to vector<1x128xf32>
    %230 = arith.mulf %45, %229 : vector<1x128xf32>
    %231 = arith.addf %227, %230 : vector<1x128xf32>
    %c61 = arith.constant 61 : index
    %232 = memref.load %arg1[%c61] : memref<221xf32, #tpu.memory_space<smem>>
    %233 = vector.broadcast %232 : f32 to vector<1x128xf32>
    %234 = arith.addf %231, %233 : vector<1x128xf32>
    %235 = math.tanh %234 : vector<1x128xf32>
    %c62 = arith.constant 62 : index
    %236 = memref.load %arg1[%c62] : memref<221xf32, #tpu.memory_space<smem>>
    %237 = vector.broadcast %236 : f32 to vector<1x128xf32>
    %238 = arith.mulf %64, %237 : vector<1x128xf32>
    %c63 = arith.constant 63 : index
    %239 = memref.load %arg1[%c63] : memref<221xf32, #tpu.memory_space<smem>>
    %240 = vector.broadcast %239 : f32 to vector<1x128xf32>
    %241 = arith.mulf %83, %240 : vector<1x128xf32>
    %242 = arith.addf %238, %241 : vector<1x128xf32>
    %c64 = arith.constant 64 : index
    %243 = memref.load %arg1[%c64] : memref<221xf32, #tpu.memory_space<smem>>
    %244 = vector.broadcast %243 : f32 to vector<1x128xf32>
    %245 = arith.mulf %102, %244 : vector<1x128xf32>
    %246 = arith.addf %242, %245 : vector<1x128xf32>
    %c65 = arith.constant 65 : index
    %247 = memref.load %arg1[%c65] : memref<221xf32, #tpu.memory_space<smem>>
    %248 = vector.broadcast %247 : f32 to vector<1x128xf32>
    %249 = arith.mulf %121, %248 : vector<1x128xf32>
    %250 = arith.addf %246, %249 : vector<1x128xf32>
    %c66 = arith.constant 66 : index
    %251 = memref.load %arg1[%c66] : memref<221xf32, #tpu.memory_space<smem>>
    %252 = vector.broadcast %251 : f32 to vector<1x128xf32>
    %253 = arith.mulf %140, %252 : vector<1x128xf32>
    %254 = arith.addf %250, %253 : vector<1x128xf32>
    %c67 = arith.constant 67 : index
    %255 = memref.load %arg1[%c67] : memref<221xf32, #tpu.memory_space<smem>>
    %256 = vector.broadcast %255 : f32 to vector<1x128xf32>
    %257 = arith.mulf %159, %256 : vector<1x128xf32>
    %258 = arith.addf %254, %257 : vector<1x128xf32>
    %c68 = arith.constant 68 : index
    %259 = memref.load %arg1[%c68] : memref<221xf32, #tpu.memory_space<smem>>
    %260 = vector.broadcast %259 : f32 to vector<1x128xf32>
    %261 = arith.mulf %178, %260 : vector<1x128xf32>
    %262 = arith.addf %258, %261 : vector<1x128xf32>
    %c69 = arith.constant 69 : index
    %263 = memref.load %arg1[%c69] : memref<221xf32, #tpu.memory_space<smem>>
    %264 = vector.broadcast %263 : f32 to vector<1x128xf32>
    %265 = arith.mulf %197, %264 : vector<1x128xf32>
    %266 = arith.addf %262, %265 : vector<1x128xf32>
    %c70 = arith.constant 70 : index
    %267 = memref.load %arg1[%c70] : memref<221xf32, #tpu.memory_space<smem>>
    %268 = vector.broadcast %267 : f32 to vector<1x128xf32>
    %269 = arith.mulf %216, %268 : vector<1x128xf32>
    %270 = arith.addf %266, %269 : vector<1x128xf32>
    %c71 = arith.constant 71 : index
    %271 = memref.load %arg1[%c71] : memref<221xf32, #tpu.memory_space<smem>>
    %272 = vector.broadcast %271 : f32 to vector<1x128xf32>
    %273 = arith.mulf %235, %272 : vector<1x128xf32>
    %274 = arith.addf %270, %273 : vector<1x128xf32>
    %c162 = arith.constant 162 : index
    %275 = memref.load %arg1[%c162] : memref<221xf32, #tpu.memory_space<smem>>
    %276 = vector.broadcast %275 : f32 to vector<1x128xf32>
    %277 = arith.addf %274, %276 : vector<1x128xf32>
    %278 = math.tanh %277 : vector<1x128xf32>
    %c72 = arith.constant 72 : index
    %279 = memref.load %arg1[%c72] : memref<221xf32, #tpu.memory_space<smem>>
    %280 = vector.broadcast %279 : f32 to vector<1x128xf32>
    %281 = arith.mulf %64, %280 : vector<1x128xf32>
    %c73 = arith.constant 73 : index
    %282 = memref.load %arg1[%c73] : memref<221xf32, #tpu.memory_space<smem>>
    %283 = vector.broadcast %282 : f32 to vector<1x128xf32>
    %284 = arith.mulf %83, %283 : vector<1x128xf32>
    %285 = arith.addf %281, %284 : vector<1x128xf32>
    %c74 = arith.constant 74 : index
    %286 = memref.load %arg1[%c74] : memref<221xf32, #tpu.memory_space<smem>>
    %287 = vector.broadcast %286 : f32 to vector<1x128xf32>
    %288 = arith.mulf %102, %287 : vector<1x128xf32>
    %289 = arith.addf %285, %288 : vector<1x128xf32>
    %c75 = arith.constant 75 : index
    %290 = memref.load %arg1[%c75] : memref<221xf32, #tpu.memory_space<smem>>
    %291 = vector.broadcast %290 : f32 to vector<1x128xf32>
    %292 = arith.mulf %121, %291 : vector<1x128xf32>
    %293 = arith.addf %289, %292 : vector<1x128xf32>
    %c76 = arith.constant 76 : index
    %294 = memref.load %arg1[%c76] : memref<221xf32, #tpu.memory_space<smem>>
    %295 = vector.broadcast %294 : f32 to vector<1x128xf32>
    %296 = arith.mulf %140, %295 : vector<1x128xf32>
    %297 = arith.addf %293, %296 : vector<1x128xf32>
    %c77 = arith.constant 77 : index
    %298 = memref.load %arg1[%c77] : memref<221xf32, #tpu.memory_space<smem>>
    %299 = vector.broadcast %298 : f32 to vector<1x128xf32>
    %300 = arith.mulf %159, %299 : vector<1x128xf32>
    %301 = arith.addf %297, %300 : vector<1x128xf32>
    %c78 = arith.constant 78 : index
    %302 = memref.load %arg1[%c78] : memref<221xf32, #tpu.memory_space<smem>>
    %303 = vector.broadcast %302 : f32 to vector<1x128xf32>
    %304 = arith.mulf %178, %303 : vector<1x128xf32>
    %305 = arith.addf %301, %304 : vector<1x128xf32>
    %c79 = arith.constant 79 : index
    %306 = memref.load %arg1[%c79] : memref<221xf32, #tpu.memory_space<smem>>
    %307 = vector.broadcast %306 : f32 to vector<1x128xf32>
    %308 = arith.mulf %197, %307 : vector<1x128xf32>
    %309 = arith.addf %305, %308 : vector<1x128xf32>
    %c80 = arith.constant 80 : index
    %310 = memref.load %arg1[%c80] : memref<221xf32, #tpu.memory_space<smem>>
    %311 = vector.broadcast %310 : f32 to vector<1x128xf32>
    %312 = arith.mulf %216, %311 : vector<1x128xf32>
    %313 = arith.addf %309, %312 : vector<1x128xf32>
    %c81 = arith.constant 81 : index
    %314 = memref.load %arg1[%c81] : memref<221xf32, #tpu.memory_space<smem>>
    %315 = vector.broadcast %314 : f32 to vector<1x128xf32>
    %316 = arith.mulf %235, %315 : vector<1x128xf32>
    %317 = arith.addf %313, %316 : vector<1x128xf32>
    %c163 = arith.constant 163 : index
    %318 = memref.load %arg1[%c163] : memref<221xf32, #tpu.memory_space<smem>>
    %319 = vector.broadcast %318 : f32 to vector<1x128xf32>
    %320 = arith.addf %317, %319 : vector<1x128xf32>
    %321 = math.tanh %320 : vector<1x128xf32>
    %c82 = arith.constant 82 : index
    %322 = memref.load %arg1[%c82] : memref<221xf32, #tpu.memory_space<smem>>
    %323 = vector.broadcast %322 : f32 to vector<1x128xf32>
    %324 = arith.mulf %64, %323 : vector<1x128xf32>
    %c83 = arith.constant 83 : index
    %325 = memref.load %arg1[%c83] : memref<221xf32, #tpu.memory_space<smem>>
    %326 = vector.broadcast %325 : f32 to vector<1x128xf32>
    %327 = arith.mulf %83, %326 : vector<1x128xf32>
    %328 = arith.addf %324, %327 : vector<1x128xf32>
    %c84 = arith.constant 84 : index
    %329 = memref.load %arg1[%c84] : memref<221xf32, #tpu.memory_space<smem>>
    %330 = vector.broadcast %329 : f32 to vector<1x128xf32>
    %331 = arith.mulf %102, %330 : vector<1x128xf32>
    %332 = arith.addf %328, %331 : vector<1x128xf32>
    %c85 = arith.constant 85 : index
    %333 = memref.load %arg1[%c85] : memref<221xf32, #tpu.memory_space<smem>>
    %334 = vector.broadcast %333 : f32 to vector<1x128xf32>
    %335 = arith.mulf %121, %334 : vector<1x128xf32>
    %336 = arith.addf %332, %335 : vector<1x128xf32>
    %c86 = arith.constant 86 : index
    %337 = memref.load %arg1[%c86] : memref<221xf32, #tpu.memory_space<smem>>
    %338 = vector.broadcast %337 : f32 to vector<1x128xf32>
    %339 = arith.mulf %140, %338 : vector<1x128xf32>
    %340 = arith.addf %336, %339 : vector<1x128xf32>
    %c87 = arith.constant 87 : index
    %341 = memref.load %arg1[%c87] : memref<221xf32, #tpu.memory_space<smem>>
    %342 = vector.broadcast %341 : f32 to vector<1x128xf32>
    %343 = arith.mulf %159, %342 : vector<1x128xf32>
    %344 = arith.addf %340, %343 : vector<1x128xf32>
    %c88 = arith.constant 88 : index
    %345 = memref.load %arg1[%c88] : memref<221xf32, #tpu.memory_space<smem>>
    %346 = vector.broadcast %345 : f32 to vector<1x128xf32>
    %347 = arith.mulf %178, %346 : vector<1x128xf32>
    %348 = arith.addf %344, %347 : vector<1x128xf32>
    %c89 = arith.constant 89 : index
    %349 = memref.load %arg1[%c89] : memref<221xf32, #tpu.memory_space<smem>>
    %350 = vector.broadcast %349 : f32 to vector<1x128xf32>
    %351 = arith.mulf %197, %350 : vector<1x128xf32>
    %352 = arith.addf %348, %351 : vector<1x128xf32>
    %c90 = arith.constant 90 : index
    %353 = memref.load %arg1[%c90] : memref<221xf32, #tpu.memory_space<smem>>
    %354 = vector.broadcast %353 : f32 to vector<1x128xf32>
    %355 = arith.mulf %216, %354 : vector<1x128xf32>
    %356 = arith.addf %352, %355 : vector<1x128xf32>
    %c91 = arith.constant 91 : index
    %357 = memref.load %arg1[%c91] : memref<221xf32, #tpu.memory_space<smem>>
    %358 = vector.broadcast %357 : f32 to vector<1x128xf32>
    %359 = arith.mulf %235, %358 : vector<1x128xf32>
    %360 = arith.addf %356, %359 : vector<1x128xf32>
    %c164 = arith.constant 164 : index
    %361 = memref.load %arg1[%c164] : memref<221xf32, #tpu.memory_space<smem>>
    %362 = vector.broadcast %361 : f32 to vector<1x128xf32>
    %363 = arith.addf %360, %362 : vector<1x128xf32>
    %364 = math.tanh %363 : vector<1x128xf32>
    %c92 = arith.constant 92 : index
    %365 = memref.load %arg1[%c92] : memref<221xf32, #tpu.memory_space<smem>>
    %366 = vector.broadcast %365 : f32 to vector<1x128xf32>
    %367 = arith.mulf %64, %366 : vector<1x128xf32>
    %c93 = arith.constant 93 : index
    %368 = memref.load %arg1[%c93] : memref<221xf32, #tpu.memory_space<smem>>
    %369 = vector.broadcast %368 : f32 to vector<1x128xf32>
    %370 = arith.mulf %83, %369 : vector<1x128xf32>
    %371 = arith.addf %367, %370 : vector<1x128xf32>
    %c94 = arith.constant 94 : index
    %372 = memref.load %arg1[%c94] : memref<221xf32, #tpu.memory_space<smem>>
    %373 = vector.broadcast %372 : f32 to vector<1x128xf32>
    %374 = arith.mulf %102, %373 : vector<1x128xf32>
    %375 = arith.addf %371, %374 : vector<1x128xf32>
    %c95 = arith.constant 95 : index
    %376 = memref.load %arg1[%c95] : memref<221xf32, #tpu.memory_space<smem>>
    %377 = vector.broadcast %376 : f32 to vector<1x128xf32>
    %378 = arith.mulf %121, %377 : vector<1x128xf32>
    %379 = arith.addf %375, %378 : vector<1x128xf32>
    %c96 = arith.constant 96 : index
    %380 = memref.load %arg1[%c96] : memref<221xf32, #tpu.memory_space<smem>>
    %381 = vector.broadcast %380 : f32 to vector<1x128xf32>
    %382 = arith.mulf %140, %381 : vector<1x128xf32>
    %383 = arith.addf %379, %382 : vector<1x128xf32>
    %c97 = arith.constant 97 : index
    %384 = memref.load %arg1[%c97] : memref<221xf32, #tpu.memory_space<smem>>
    %385 = vector.broadcast %384 : f32 to vector<1x128xf32>
    %386 = arith.mulf %159, %385 : vector<1x128xf32>
    %387 = arith.addf %383, %386 : vector<1x128xf32>
    %c98 = arith.constant 98 : index
    %388 = memref.load %arg1[%c98] : memref<221xf32, #tpu.memory_space<smem>>
    %389 = vector.broadcast %388 : f32 to vector<1x128xf32>
    %390 = arith.mulf %178, %389 : vector<1x128xf32>
    %391 = arith.addf %387, %390 : vector<1x128xf32>
    %c99 = arith.constant 99 : index
    %392 = memref.load %arg1[%c99] : memref<221xf32, #tpu.memory_space<smem>>
    %393 = vector.broadcast %392 : f32 to vector<1x128xf32>
    %394 = arith.mulf %197, %393 : vector<1x128xf32>
    %395 = arith.addf %391, %394 : vector<1x128xf32>
    %c100 = arith.constant 100 : index
    %396 = memref.load %arg1[%c100] : memref<221xf32, #tpu.memory_space<smem>>
    %397 = vector.broadcast %396 : f32 to vector<1x128xf32>
    %398 = arith.mulf %216, %397 : vector<1x128xf32>
    %399 = arith.addf %395, %398 : vector<1x128xf32>
    %c101 = arith.constant 101 : index
    %400 = memref.load %arg1[%c101] : memref<221xf32, #tpu.memory_space<smem>>
    %401 = vector.broadcast %400 : f32 to vector<1x128xf32>
    %402 = arith.mulf %235, %401 : vector<1x128xf32>
    %403 = arith.addf %399, %402 : vector<1x128xf32>
    %c165 = arith.constant 165 : index
    %404 = memref.load %arg1[%c165] : memref<221xf32, #tpu.memory_space<smem>>
    %405 = vector.broadcast %404 : f32 to vector<1x128xf32>
    %406 = arith.addf %403, %405 : vector<1x128xf32>
    %407 = math.tanh %406 : vector<1x128xf32>
    %c102 = arith.constant 102 : index
    %408 = memref.load %arg1[%c102] : memref<221xf32, #tpu.memory_space<smem>>
    %409 = vector.broadcast %408 : f32 to vector<1x128xf32>
    %410 = arith.mulf %64, %409 : vector<1x128xf32>
    %c103 = arith.constant 103 : index
    %411 = memref.load %arg1[%c103] : memref<221xf32, #tpu.memory_space<smem>>
    %412 = vector.broadcast %411 : f32 to vector<1x128xf32>
    %413 = arith.mulf %83, %412 : vector<1x128xf32>
    %414 = arith.addf %410, %413 : vector<1x128xf32>
    %c104 = arith.constant 104 : index
    %415 = memref.load %arg1[%c104] : memref<221xf32, #tpu.memory_space<smem>>
    %416 = vector.broadcast %415 : f32 to vector<1x128xf32>
    %417 = arith.mulf %102, %416 : vector<1x128xf32>
    %418 = arith.addf %414, %417 : vector<1x128xf32>
    %c105 = arith.constant 105 : index
    %419 = memref.load %arg1[%c105] : memref<221xf32, #tpu.memory_space<smem>>
    %420 = vector.broadcast %419 : f32 to vector<1x128xf32>
    %421 = arith.mulf %121, %420 : vector<1x128xf32>
    %422 = arith.addf %418, %421 : vector<1x128xf32>
    %c106 = arith.constant 106 : index
    %423 = memref.load %arg1[%c106] : memref<221xf32, #tpu.memory_space<smem>>
    %424 = vector.broadcast %423 : f32 to vector<1x128xf32>
    %425 = arith.mulf %140, %424 : vector<1x128xf32>
    %426 = arith.addf %422, %425 : vector<1x128xf32>
    %c107 = arith.constant 107 : index
    %427 = memref.load %arg1[%c107] : memref<221xf32, #tpu.memory_space<smem>>
    %428 = vector.broadcast %427 : f32 to vector<1x128xf32>
    %429 = arith.mulf %159, %428 : vector<1x128xf32>
    %430 = arith.addf %426, %429 : vector<1x128xf32>
    %c108 = arith.constant 108 : index
    %431 = memref.load %arg1[%c108] : memref<221xf32, #tpu.memory_space<smem>>
    %432 = vector.broadcast %431 : f32 to vector<1x128xf32>
    %433 = arith.mulf %178, %432 : vector<1x128xf32>
    %434 = arith.addf %430, %433 : vector<1x128xf32>
    %c109 = arith.constant 109 : index
    %435 = memref.load %arg1[%c109] : memref<221xf32, #tpu.memory_space<smem>>
    %436 = vector.broadcast %435 : f32 to vector<1x128xf32>
    %437 = arith.mulf %197, %436 : vector<1x128xf32>
    %438 = arith.addf %434, %437 : vector<1x128xf32>
    %c110 = arith.constant 110 : index
    %439 = memref.load %arg1[%c110] : memref<221xf32, #tpu.memory_space<smem>>
    %440 = vector.broadcast %439 : f32 to vector<1x128xf32>
    %441 = arith.mulf %216, %440 : vector<1x128xf32>
    %442 = arith.addf %438, %441 : vector<1x128xf32>
    %c111 = arith.constant 111 : index
    %443 = memref.load %arg1[%c111] : memref<221xf32, #tpu.memory_space<smem>>
    %444 = vector.broadcast %443 : f32 to vector<1x128xf32>
    %445 = arith.mulf %235, %444 : vector<1x128xf32>
    %446 = arith.addf %442, %445 : vector<1x128xf32>
    %c166 = arith.constant 166 : index
    %447 = memref.load %arg1[%c166] : memref<221xf32, #tpu.memory_space<smem>>
    %448 = vector.broadcast %447 : f32 to vector<1x128xf32>
    %449 = arith.addf %446, %448 : vector<1x128xf32>
    %450 = math.tanh %449 : vector<1x128xf32>
    %c112 = arith.constant 112 : index
    %451 = memref.load %arg1[%c112] : memref<221xf32, #tpu.memory_space<smem>>
    %452 = vector.broadcast %451 : f32 to vector<1x128xf32>
    %453 = arith.mulf %64, %452 : vector<1x128xf32>
    %c113 = arith.constant 113 : index
    %454 = memref.load %arg1[%c113] : memref<221xf32, #tpu.memory_space<smem>>
    %455 = vector.broadcast %454 : f32 to vector<1x128xf32>
    %456 = arith.mulf %83, %455 : vector<1x128xf32>
    %457 = arith.addf %453, %456 : vector<1x128xf32>
    %c114 = arith.constant 114 : index
    %458 = memref.load %arg1[%c114] : memref<221xf32, #tpu.memory_space<smem>>
    %459 = vector.broadcast %458 : f32 to vector<1x128xf32>
    %460 = arith.mulf %102, %459 : vector<1x128xf32>
    %461 = arith.addf %457, %460 : vector<1x128xf32>
    %c115 = arith.constant 115 : index
    %462 = memref.load %arg1[%c115] : memref<221xf32, #tpu.memory_space<smem>>
    %463 = vector.broadcast %462 : f32 to vector<1x128xf32>
    %464 = arith.mulf %121, %463 : vector<1x128xf32>
    %465 = arith.addf %461, %464 : vector<1x128xf32>
    %c116 = arith.constant 116 : index
    %466 = memref.load %arg1[%c116] : memref<221xf32, #tpu.memory_space<smem>>
    %467 = vector.broadcast %466 : f32 to vector<1x128xf32>
    %468 = arith.mulf %140, %467 : vector<1x128xf32>
    %469 = arith.addf %465, %468 : vector<1x128xf32>
    %c117 = arith.constant 117 : index
    %470 = memref.load %arg1[%c117] : memref<221xf32, #tpu.memory_space<smem>>
    %471 = vector.broadcast %470 : f32 to vector<1x128xf32>
    %472 = arith.mulf %159, %471 : vector<1x128xf32>
    %473 = arith.addf %469, %472 : vector<1x128xf32>
    %c118 = arith.constant 118 : index
    %474 = memref.load %arg1[%c118] : memref<221xf32, #tpu.memory_space<smem>>
    %475 = vector.broadcast %474 : f32 to vector<1x128xf32>
    %476 = arith.mulf %178, %475 : vector<1x128xf32>
    %477 = arith.addf %473, %476 : vector<1x128xf32>
    %c119 = arith.constant 119 : index
    %478 = memref.load %arg1[%c119] : memref<221xf32, #tpu.memory_space<smem>>
    %479 = vector.broadcast %478 : f32 to vector<1x128xf32>
    %480 = arith.mulf %197, %479 : vector<1x128xf32>
    %481 = arith.addf %477, %480 : vector<1x128xf32>
    %c120 = arith.constant 120 : index
    %482 = memref.load %arg1[%c120] : memref<221xf32, #tpu.memory_space<smem>>
    %483 = vector.broadcast %482 : f32 to vector<1x128xf32>
    %484 = arith.mulf %216, %483 : vector<1x128xf32>
    %485 = arith.addf %481, %484 : vector<1x128xf32>
    %c121 = arith.constant 121 : index
    %486 = memref.load %arg1[%c121] : memref<221xf32, #tpu.memory_space<smem>>
    %487 = vector.broadcast %486 : f32 to vector<1x128xf32>
    %488 = arith.mulf %235, %487 : vector<1x128xf32>
    %489 = arith.addf %485, %488 : vector<1x128xf32>
    %c167 = arith.constant 167 : index
    %490 = memref.load %arg1[%c167] : memref<221xf32, #tpu.memory_space<smem>>
    %491 = vector.broadcast %490 : f32 to vector<1x128xf32>
    %492 = arith.addf %489, %491 : vector<1x128xf32>
    %493 = math.tanh %492 : vector<1x128xf32>
    %c122 = arith.constant 122 : index
    %494 = memref.load %arg1[%c122] : memref<221xf32, #tpu.memory_space<smem>>
    %495 = vector.broadcast %494 : f32 to vector<1x128xf32>
    %496 = arith.mulf %64, %495 : vector<1x128xf32>
    %c123 = arith.constant 123 : index
    %497 = memref.load %arg1[%c123] : memref<221xf32, #tpu.memory_space<smem>>
    %498 = vector.broadcast %497 : f32 to vector<1x128xf32>
    %499 = arith.mulf %83, %498 : vector<1x128xf32>
    %500 = arith.addf %496, %499 : vector<1x128xf32>
    %c124 = arith.constant 124 : index
    %501 = memref.load %arg1[%c124] : memref<221xf32, #tpu.memory_space<smem>>
    %502 = vector.broadcast %501 : f32 to vector<1x128xf32>
    %503 = arith.mulf %102, %502 : vector<1x128xf32>
    %504 = arith.addf %500, %503 : vector<1x128xf32>
    %c125 = arith.constant 125 : index
    %505 = memref.load %arg1[%c125] : memref<221xf32, #tpu.memory_space<smem>>
    %506 = vector.broadcast %505 : f32 to vector<1x128xf32>
    %507 = arith.mulf %121, %506 : vector<1x128xf32>
    %508 = arith.addf %504, %507 : vector<1x128xf32>
    %c126 = arith.constant 126 : index
    %509 = memref.load %arg1[%c126] : memref<221xf32, #tpu.memory_space<smem>>
    %510 = vector.broadcast %509 : f32 to vector<1x128xf32>
    %511 = arith.mulf %140, %510 : vector<1x128xf32>
    %512 = arith.addf %508, %511 : vector<1x128xf32>
    %c127 = arith.constant 127 : index
    %513 = memref.load %arg1[%c127] : memref<221xf32, #tpu.memory_space<smem>>
    %514 = vector.broadcast %513 : f32 to vector<1x128xf32>
    %515 = arith.mulf %159, %514 : vector<1x128xf32>
    %516 = arith.addf %512, %515 : vector<1x128xf32>
    %c128 = arith.constant 128 : index
    %517 = memref.load %arg1[%c128] : memref<221xf32, #tpu.memory_space<smem>>
    %518 = vector.broadcast %517 : f32 to vector<1x128xf32>
    %519 = arith.mulf %178, %518 : vector<1x128xf32>
    %520 = arith.addf %516, %519 : vector<1x128xf32>
    %c129 = arith.constant 129 : index
    %521 = memref.load %arg1[%c129] : memref<221xf32, #tpu.memory_space<smem>>
    %522 = vector.broadcast %521 : f32 to vector<1x128xf32>
    %523 = arith.mulf %197, %522 : vector<1x128xf32>
    %524 = arith.addf %520, %523 : vector<1x128xf32>
    %c130 = arith.constant 130 : index
    %525 = memref.load %arg1[%c130] : memref<221xf32, #tpu.memory_space<smem>>
    %526 = vector.broadcast %525 : f32 to vector<1x128xf32>
    %527 = arith.mulf %216, %526 : vector<1x128xf32>
    %528 = arith.addf %524, %527 : vector<1x128xf32>
    %c131 = arith.constant 131 : index
    %529 = memref.load %arg1[%c131] : memref<221xf32, #tpu.memory_space<smem>>
    %530 = vector.broadcast %529 : f32 to vector<1x128xf32>
    %531 = arith.mulf %235, %530 : vector<1x128xf32>
    %532 = arith.addf %528, %531 : vector<1x128xf32>
    %c168 = arith.constant 168 : index
    %533 = memref.load %arg1[%c168] : memref<221xf32, #tpu.memory_space<smem>>
    %534 = vector.broadcast %533 : f32 to vector<1x128xf32>
    %535 = arith.addf %532, %534 : vector<1x128xf32>
    %536 = math.tanh %535 : vector<1x128xf32>
    %c132 = arith.constant 132 : index
    %537 = memref.load %arg1[%c132] : memref<221xf32, #tpu.memory_space<smem>>
    %538 = vector.broadcast %537 : f32 to vector<1x128xf32>
    %539 = arith.mulf %64, %538 : vector<1x128xf32>
    %c133 = arith.constant 133 : index
    %540 = memref.load %arg1[%c133] : memref<221xf32, #tpu.memory_space<smem>>
    %541 = vector.broadcast %540 : f32 to vector<1x128xf32>
    %542 = arith.mulf %83, %541 : vector<1x128xf32>
    %543 = arith.addf %539, %542 : vector<1x128xf32>
    %c134 = arith.constant 134 : index
    %544 = memref.load %arg1[%c134] : memref<221xf32, #tpu.memory_space<smem>>
    %545 = vector.broadcast %544 : f32 to vector<1x128xf32>
    %546 = arith.mulf %102, %545 : vector<1x128xf32>
    %547 = arith.addf %543, %546 : vector<1x128xf32>
    %c135 = arith.constant 135 : index
    %548 = memref.load %arg1[%c135] : memref<221xf32, #tpu.memory_space<smem>>
    %549 = vector.broadcast %548 : f32 to vector<1x128xf32>
    %550 = arith.mulf %121, %549 : vector<1x128xf32>
    %551 = arith.addf %547, %550 : vector<1x128xf32>
    %c136 = arith.constant 136 : index
    %552 = memref.load %arg1[%c136] : memref<221xf32, #tpu.memory_space<smem>>
    %553 = vector.broadcast %552 : f32 to vector<1x128xf32>
    %554 = arith.mulf %140, %553 : vector<1x128xf32>
    %555 = arith.addf %551, %554 : vector<1x128xf32>
    %c137 = arith.constant 137 : index
    %556 = memref.load %arg1[%c137] : memref<221xf32, #tpu.memory_space<smem>>
    %557 = vector.broadcast %556 : f32 to vector<1x128xf32>
    %558 = arith.mulf %159, %557 : vector<1x128xf32>
    %559 = arith.addf %555, %558 : vector<1x128xf32>
    %c138 = arith.constant 138 : index
    %560 = memref.load %arg1[%c138] : memref<221xf32, #tpu.memory_space<smem>>
    %561 = vector.broadcast %560 : f32 to vector<1x128xf32>
    %562 = arith.mulf %178, %561 : vector<1x128xf32>
    %563 = arith.addf %559, %562 : vector<1x128xf32>
    %c139 = arith.constant 139 : index
    %564 = memref.load %arg1[%c139] : memref<221xf32, #tpu.memory_space<smem>>
    %565 = vector.broadcast %564 : f32 to vector<1x128xf32>
    %566 = arith.mulf %197, %565 : vector<1x128xf32>
    %567 = arith.addf %563, %566 : vector<1x128xf32>
    %c140 = arith.constant 140 : index
    %568 = memref.load %arg1[%c140] : memref<221xf32, #tpu.memory_space<smem>>
    %569 = vector.broadcast %568 : f32 to vector<1x128xf32>
    %570 = arith.mulf %216, %569 : vector<1x128xf32>
    %571 = arith.addf %567, %570 : vector<1x128xf32>
    %c141 = arith.constant 141 : index
    %572 = memref.load %arg1[%c141] : memref<221xf32, #tpu.memory_space<smem>>
    %573 = vector.broadcast %572 : f32 to vector<1x128xf32>
    %574 = arith.mulf %235, %573 : vector<1x128xf32>
    %575 = arith.addf %571, %574 : vector<1x128xf32>
    %c169 = arith.constant 169 : index
    %576 = memref.load %arg1[%c169] : memref<221xf32, #tpu.memory_space<smem>>
    %577 = vector.broadcast %576 : f32 to vector<1x128xf32>
    %578 = arith.addf %575, %577 : vector<1x128xf32>
    %579 = math.tanh %578 : vector<1x128xf32>
    %c142 = arith.constant 142 : index
    %580 = memref.load %arg1[%c142] : memref<221xf32, #tpu.memory_space<smem>>
    %581 = vector.broadcast %580 : f32 to vector<1x128xf32>
    %582 = arith.mulf %64, %581 : vector<1x128xf32>
    %c143 = arith.constant 143 : index
    %583 = memref.load %arg1[%c143] : memref<221xf32, #tpu.memory_space<smem>>
    %584 = vector.broadcast %583 : f32 to vector<1x128xf32>
    %585 = arith.mulf %83, %584 : vector<1x128xf32>
    %586 = arith.addf %582, %585 : vector<1x128xf32>
    %c144 = arith.constant 144 : index
    %587 = memref.load %arg1[%c144] : memref<221xf32, #tpu.memory_space<smem>>
    %588 = vector.broadcast %587 : f32 to vector<1x128xf32>
    %589 = arith.mulf %102, %588 : vector<1x128xf32>
    %590 = arith.addf %586, %589 : vector<1x128xf32>
    %c145 = arith.constant 145 : index
    %591 = memref.load %arg1[%c145] : memref<221xf32, #tpu.memory_space<smem>>
    %592 = vector.broadcast %591 : f32 to vector<1x128xf32>
    %593 = arith.mulf %121, %592 : vector<1x128xf32>
    %594 = arith.addf %590, %593 : vector<1x128xf32>
    %c146 = arith.constant 146 : index
    %595 = memref.load %arg1[%c146] : memref<221xf32, #tpu.memory_space<smem>>
    %596 = vector.broadcast %595 : f32 to vector<1x128xf32>
    %597 = arith.mulf %140, %596 : vector<1x128xf32>
    %598 = arith.addf %594, %597 : vector<1x128xf32>
    %c147 = arith.constant 147 : index
    %599 = memref.load %arg1[%c147] : memref<221xf32, #tpu.memory_space<smem>>
    %600 = vector.broadcast %599 : f32 to vector<1x128xf32>
    %601 = arith.mulf %159, %600 : vector<1x128xf32>
    %602 = arith.addf %598, %601 : vector<1x128xf32>
    %c148 = arith.constant 148 : index
    %603 = memref.load %arg1[%c148] : memref<221xf32, #tpu.memory_space<smem>>
    %604 = vector.broadcast %603 : f32 to vector<1x128xf32>
    %605 = arith.mulf %178, %604 : vector<1x128xf32>
    %606 = arith.addf %602, %605 : vector<1x128xf32>
    %c149 = arith.constant 149 : index
    %607 = memref.load %arg1[%c149] : memref<221xf32, #tpu.memory_space<smem>>
    %608 = vector.broadcast %607 : f32 to vector<1x128xf32>
    %609 = arith.mulf %197, %608 : vector<1x128xf32>
    %610 = arith.addf %606, %609 : vector<1x128xf32>
    %c150 = arith.constant 150 : index
    %611 = memref.load %arg1[%c150] : memref<221xf32, #tpu.memory_space<smem>>
    %612 = vector.broadcast %611 : f32 to vector<1x128xf32>
    %613 = arith.mulf %216, %612 : vector<1x128xf32>
    %614 = arith.addf %610, %613 : vector<1x128xf32>
    %c151 = arith.constant 151 : index
    %615 = memref.load %arg1[%c151] : memref<221xf32, #tpu.memory_space<smem>>
    %616 = vector.broadcast %615 : f32 to vector<1x128xf32>
    %617 = arith.mulf %235, %616 : vector<1x128xf32>
    %618 = arith.addf %614, %617 : vector<1x128xf32>
    %c170 = arith.constant 170 : index
    %619 = memref.load %arg1[%c170] : memref<221xf32, #tpu.memory_space<smem>>
    %620 = vector.broadcast %619 : f32 to vector<1x128xf32>
    %621 = arith.addf %618, %620 : vector<1x128xf32>
    %622 = math.tanh %621 : vector<1x128xf32>
    %c152 = arith.constant 152 : index
    %623 = memref.load %arg1[%c152] : memref<221xf32, #tpu.memory_space<smem>>
    %624 = vector.broadcast %623 : f32 to vector<1x128xf32>
    %625 = arith.mulf %64, %624 : vector<1x128xf32>
    %c153 = arith.constant 153 : index
    %626 = memref.load %arg1[%c153] : memref<221xf32, #tpu.memory_space<smem>>
    %627 = vector.broadcast %626 : f32 to vector<1x128xf32>
    %628 = arith.mulf %83, %627 : vector<1x128xf32>
    %629 = arith.addf %625, %628 : vector<1x128xf32>
    %c154 = arith.constant 154 : index
    %630 = memref.load %arg1[%c154] : memref<221xf32, #tpu.memory_space<smem>>
    %631 = vector.broadcast %630 : f32 to vector<1x128xf32>
    %632 = arith.mulf %102, %631 : vector<1x128xf32>
    %633 = arith.addf %629, %632 : vector<1x128xf32>
    %c155 = arith.constant 155 : index
    %634 = memref.load %arg1[%c155] : memref<221xf32, #tpu.memory_space<smem>>
    %635 = vector.broadcast %634 : f32 to vector<1x128xf32>
    %636 = arith.mulf %121, %635 : vector<1x128xf32>
    %637 = arith.addf %633, %636 : vector<1x128xf32>
    %c156 = arith.constant 156 : index
    %638 = memref.load %arg1[%c156] : memref<221xf32, #tpu.memory_space<smem>>
    %639 = vector.broadcast %638 : f32 to vector<1x128xf32>
    %640 = arith.mulf %140, %639 : vector<1x128xf32>
    %641 = arith.addf %637, %640 : vector<1x128xf32>
    %c157 = arith.constant 157 : index
    %642 = memref.load %arg1[%c157] : memref<221xf32, #tpu.memory_space<smem>>
    %643 = vector.broadcast %642 : f32 to vector<1x128xf32>
    %644 = arith.mulf %159, %643 : vector<1x128xf32>
    %645 = arith.addf %641, %644 : vector<1x128xf32>
    %c158 = arith.constant 158 : index
    %646 = memref.load %arg1[%c158] : memref<221xf32, #tpu.memory_space<smem>>
    %647 = vector.broadcast %646 : f32 to vector<1x128xf32>
    %648 = arith.mulf %178, %647 : vector<1x128xf32>
    %649 = arith.addf %645, %648 : vector<1x128xf32>
    %c159 = arith.constant 159 : index
    %650 = memref.load %arg1[%c159] : memref<221xf32, #tpu.memory_space<smem>>
    %651 = vector.broadcast %650 : f32 to vector<1x128xf32>
    %652 = arith.mulf %197, %651 : vector<1x128xf32>
    %653 = arith.addf %649, %652 : vector<1x128xf32>
    %c160 = arith.constant 160 : index
    %654 = memref.load %arg1[%c160] : memref<221xf32, #tpu.memory_space<smem>>
    %655 = vector.broadcast %654 : f32 to vector<1x128xf32>
    %656 = arith.mulf %216, %655 : vector<1x128xf32>
    %657 = arith.addf %653, %656 : vector<1x128xf32>
    %c161 = arith.constant 161 : index
    %658 = memref.load %arg1[%c161] : memref<221xf32, #tpu.memory_space<smem>>
    %659 = vector.broadcast %658 : f32 to vector<1x128xf32>
    %660 = arith.mulf %235, %659 : vector<1x128xf32>
    %661 = arith.addf %657, %660 : vector<1x128xf32>
    %c171 = arith.constant 171 : index
    %662 = memref.load %arg1[%c171] : memref<221xf32, #tpu.memory_space<smem>>
    %663 = vector.broadcast %662 : f32 to vector<1x128xf32>
    %664 = arith.addf %661, %663 : vector<1x128xf32>
    %665 = math.tanh %664 : vector<1x128xf32>
    %c172 = arith.constant 172 : index
    %666 = memref.load %arg1[%c172] : memref<221xf32, #tpu.memory_space<smem>>
    %667 = vector.broadcast %666 : f32 to vector<1x128xf32>
    %668 = arith.mulf %278, %667 : vector<1x128xf32>
    %c173 = arith.constant 173 : index
    %669 = memref.load %arg1[%c173] : memref<221xf32, #tpu.memory_space<smem>>
    %670 = vector.broadcast %669 : f32 to vector<1x128xf32>
    %671 = arith.mulf %321, %670 : vector<1x128xf32>
    %672 = arith.addf %668, %671 : vector<1x128xf32>
    %c174 = arith.constant 174 : index
    %673 = memref.load %arg1[%c174] : memref<221xf32, #tpu.memory_space<smem>>
    %674 = vector.broadcast %673 : f32 to vector<1x128xf32>
    %675 = arith.mulf %364, %674 : vector<1x128xf32>
    %676 = arith.addf %672, %675 : vector<1x128xf32>
    %c175 = arith.constant 175 : index
    %677 = memref.load %arg1[%c175] : memref<221xf32, #tpu.memory_space<smem>>
    %678 = vector.broadcast %677 : f32 to vector<1x128xf32>
    %679 = arith.mulf %407, %678 : vector<1x128xf32>
    %680 = arith.addf %676, %679 : vector<1x128xf32>
    %c176 = arith.constant 176 : index
    %681 = memref.load %arg1[%c176] : memref<221xf32, #tpu.memory_space<smem>>
    %682 = vector.broadcast %681 : f32 to vector<1x128xf32>
    %683 = arith.mulf %450, %682 : vector<1x128xf32>
    %684 = arith.addf %680, %683 : vector<1x128xf32>
    %c177 = arith.constant 177 : index
    %685 = memref.load %arg1[%c177] : memref<221xf32, #tpu.memory_space<smem>>
    %686 = vector.broadcast %685 : f32 to vector<1x128xf32>
    %687 = arith.mulf %493, %686 : vector<1x128xf32>
    %688 = arith.addf %684, %687 : vector<1x128xf32>
    %c178 = arith.constant 178 : index
    %689 = memref.load %arg1[%c178] : memref<221xf32, #tpu.memory_space<smem>>
    %690 = vector.broadcast %689 : f32 to vector<1x128xf32>
    %691 = arith.mulf %536, %690 : vector<1x128xf32>
    %692 = arith.addf %688, %691 : vector<1x128xf32>
    %c179 = arith.constant 179 : index
    %693 = memref.load %arg1[%c179] : memref<221xf32, #tpu.memory_space<smem>>
    %694 = vector.broadcast %693 : f32 to vector<1x128xf32>
    %695 = arith.mulf %579, %694 : vector<1x128xf32>
    %696 = arith.addf %692, %695 : vector<1x128xf32>
    %c180 = arith.constant 180 : index
    %697 = memref.load %arg1[%c180] : memref<221xf32, #tpu.memory_space<smem>>
    %698 = vector.broadcast %697 : f32 to vector<1x128xf32>
    %699 = arith.mulf %622, %698 : vector<1x128xf32>
    %700 = arith.addf %696, %699 : vector<1x128xf32>
    %c181 = arith.constant 181 : index
    %701 = memref.load %arg1[%c181] : memref<221xf32, #tpu.memory_space<smem>>
    %702 = vector.broadcast %701 : f32 to vector<1x128xf32>
    %703 = arith.mulf %665, %702 : vector<1x128xf32>
    %704 = arith.addf %700, %703 : vector<1x128xf32>
    %c212 = arith.constant 212 : index
    %705 = memref.load %arg1[%c212] : memref<221xf32, #tpu.memory_space<smem>>
    %706 = vector.broadcast %705 : f32 to vector<1x128xf32>
    %707 = arith.addf %704, %706 : vector<1x128xf32>
    %708 = math.tanh %707 : vector<1x128xf32>
    %c182 = arith.constant 182 : index
    %709 = memref.load %arg1[%c182] : memref<221xf32, #tpu.memory_space<smem>>
    %710 = vector.broadcast %709 : f32 to vector<1x128xf32>
    %711 = arith.mulf %278, %710 : vector<1x128xf32>
    %c183 = arith.constant 183 : index
    %712 = memref.load %arg1[%c183] : memref<221xf32, #tpu.memory_space<smem>>
    %713 = vector.broadcast %712 : f32 to vector<1x128xf32>
    %714 = arith.mulf %321, %713 : vector<1x128xf32>
    %715 = arith.addf %711, %714 : vector<1x128xf32>
    %c184 = arith.constant 184 : index
    %716 = memref.load %arg1[%c184] : memref<221xf32, #tpu.memory_space<smem>>
    %717 = vector.broadcast %716 : f32 to vector<1x128xf32>
    %718 = arith.mulf %364, %717 : vector<1x128xf32>
    %719 = arith.addf %715, %718 : vector<1x128xf32>
    %c185 = arith.constant 185 : index
    %720 = memref.load %arg1[%c185] : memref<221xf32, #tpu.memory_space<smem>>
    %721 = vector.broadcast %720 : f32 to vector<1x128xf32>
    %722 = arith.mulf %407, %721 : vector<1x128xf32>
    %723 = arith.addf %719, %722 : vector<1x128xf32>
    %c186 = arith.constant 186 : index
    %724 = memref.load %arg1[%c186] : memref<221xf32, #tpu.memory_space<smem>>
    %725 = vector.broadcast %724 : f32 to vector<1x128xf32>
    %726 = arith.mulf %450, %725 : vector<1x128xf32>
    %727 = arith.addf %723, %726 : vector<1x128xf32>
    %c187 = arith.constant 187 : index
    %728 = memref.load %arg1[%c187] : memref<221xf32, #tpu.memory_space<smem>>
    %729 = vector.broadcast %728 : f32 to vector<1x128xf32>
    %730 = arith.mulf %493, %729 : vector<1x128xf32>
    %731 = arith.addf %727, %730 : vector<1x128xf32>
    %c188 = arith.constant 188 : index
    %732 = memref.load %arg1[%c188] : memref<221xf32, #tpu.memory_space<smem>>
    %733 = vector.broadcast %732 : f32 to vector<1x128xf32>
    %734 = arith.mulf %536, %733 : vector<1x128xf32>
    %735 = arith.addf %731, %734 : vector<1x128xf32>
    %c189 = arith.constant 189 : index
    %736 = memref.load %arg1[%c189] : memref<221xf32, #tpu.memory_space<smem>>
    %737 = vector.broadcast %736 : f32 to vector<1x128xf32>
    %738 = arith.mulf %579, %737 : vector<1x128xf32>
    %739 = arith.addf %735, %738 : vector<1x128xf32>
    %c190 = arith.constant 190 : index
    %740 = memref.load %arg1[%c190] : memref<221xf32, #tpu.memory_space<smem>>
    %741 = vector.broadcast %740 : f32 to vector<1x128xf32>
    %742 = arith.mulf %622, %741 : vector<1x128xf32>
    %743 = arith.addf %739, %742 : vector<1x128xf32>
    %c191 = arith.constant 191 : index
    %744 = memref.load %arg1[%c191] : memref<221xf32, #tpu.memory_space<smem>>
    %745 = vector.broadcast %744 : f32 to vector<1x128xf32>
    %746 = arith.mulf %665, %745 : vector<1x128xf32>
    %747 = arith.addf %743, %746 : vector<1x128xf32>
    %c213 = arith.constant 213 : index
    %748 = memref.load %arg1[%c213] : memref<221xf32, #tpu.memory_space<smem>>
    %749 = vector.broadcast %748 : f32 to vector<1x128xf32>
    %750 = arith.addf %747, %749 : vector<1x128xf32>
    %751 = math.tanh %750 : vector<1x128xf32>
    %c192 = arith.constant 192 : index
    %752 = memref.load %arg1[%c192] : memref<221xf32, #tpu.memory_space<smem>>
    %753 = vector.broadcast %752 : f32 to vector<1x128xf32>
    %754 = arith.mulf %278, %753 : vector<1x128xf32>
    %c193 = arith.constant 193 : index
    %755 = memref.load %arg1[%c193] : memref<221xf32, #tpu.memory_space<smem>>
    %756 = vector.broadcast %755 : f32 to vector<1x128xf32>
    %757 = arith.mulf %321, %756 : vector<1x128xf32>
    %758 = arith.addf %754, %757 : vector<1x128xf32>
    %c194 = arith.constant 194 : index
    %759 = memref.load %arg1[%c194] : memref<221xf32, #tpu.memory_space<smem>>
    %760 = vector.broadcast %759 : f32 to vector<1x128xf32>
    %761 = arith.mulf %364, %760 : vector<1x128xf32>
    %762 = arith.addf %758, %761 : vector<1x128xf32>
    %c195 = arith.constant 195 : index
    %763 = memref.load %arg1[%c195] : memref<221xf32, #tpu.memory_space<smem>>
    %764 = vector.broadcast %763 : f32 to vector<1x128xf32>
    %765 = arith.mulf %407, %764 : vector<1x128xf32>
    %766 = arith.addf %762, %765 : vector<1x128xf32>
    %c196 = arith.constant 196 : index
    %767 = memref.load %arg1[%c196] : memref<221xf32, #tpu.memory_space<smem>>
    %768 = vector.broadcast %767 : f32 to vector<1x128xf32>
    %769 = arith.mulf %450, %768 : vector<1x128xf32>
    %770 = arith.addf %766, %769 : vector<1x128xf32>
    %c197 = arith.constant 197 : index
    %771 = memref.load %arg1[%c197] : memref<221xf32, #tpu.memory_space<smem>>
    %772 = vector.broadcast %771 : f32 to vector<1x128xf32>
    %773 = arith.mulf %493, %772 : vector<1x128xf32>
    %774 = arith.addf %770, %773 : vector<1x128xf32>
    %c198 = arith.constant 198 : index
    %775 = memref.load %arg1[%c198] : memref<221xf32, #tpu.memory_space<smem>>
    %776 = vector.broadcast %775 : f32 to vector<1x128xf32>
    %777 = arith.mulf %536, %776 : vector<1x128xf32>
    %778 = arith.addf %774, %777 : vector<1x128xf32>
    %c199 = arith.constant 199 : index
    %779 = memref.load %arg1[%c199] : memref<221xf32, #tpu.memory_space<smem>>
    %780 = vector.broadcast %779 : f32 to vector<1x128xf32>
    %781 = arith.mulf %579, %780 : vector<1x128xf32>
    %782 = arith.addf %778, %781 : vector<1x128xf32>
    %c200 = arith.constant 200 : index
    %783 = memref.load %arg1[%c200] : memref<221xf32, #tpu.memory_space<smem>>
    %784 = vector.broadcast %783 : f32 to vector<1x128xf32>
    %785 = arith.mulf %622, %784 : vector<1x128xf32>
    %786 = arith.addf %782, %785 : vector<1x128xf32>
    %c201 = arith.constant 201 : index
    %787 = memref.load %arg1[%c201] : memref<221xf32, #tpu.memory_space<smem>>
    %788 = vector.broadcast %787 : f32 to vector<1x128xf32>
    %789 = arith.mulf %665, %788 : vector<1x128xf32>
    %790 = arith.addf %786, %789 : vector<1x128xf32>
    %c214 = arith.constant 214 : index
    %791 = memref.load %arg1[%c214] : memref<221xf32, #tpu.memory_space<smem>>
    %792 = vector.broadcast %791 : f32 to vector<1x128xf32>
    %793 = arith.addf %790, %792 : vector<1x128xf32>
    %794 = math.tanh %793 : vector<1x128xf32>
    %c202 = arith.constant 202 : index
    %795 = memref.load %arg1[%c202] : memref<221xf32, #tpu.memory_space<smem>>
    %796 = vector.broadcast %795 : f32 to vector<1x128xf32>
    %797 = arith.mulf %278, %796 : vector<1x128xf32>
    %c203 = arith.constant 203 : index
    %798 = memref.load %arg1[%c203] : memref<221xf32, #tpu.memory_space<smem>>
    %799 = vector.broadcast %798 : f32 to vector<1x128xf32>
    %800 = arith.mulf %321, %799 : vector<1x128xf32>
    %801 = arith.addf %797, %800 : vector<1x128xf32>
    %c204 = arith.constant 204 : index
    %802 = memref.load %arg1[%c204] : memref<221xf32, #tpu.memory_space<smem>>
    %803 = vector.broadcast %802 : f32 to vector<1x128xf32>
    %804 = arith.mulf %364, %803 : vector<1x128xf32>
    %805 = arith.addf %801, %804 : vector<1x128xf32>
    %c205 = arith.constant 205 : index
    %806 = memref.load %arg1[%c205] : memref<221xf32, #tpu.memory_space<smem>>
    %807 = vector.broadcast %806 : f32 to vector<1x128xf32>
    %808 = arith.mulf %407, %807 : vector<1x128xf32>
    %809 = arith.addf %805, %808 : vector<1x128xf32>
    %c206 = arith.constant 206 : index
    %810 = memref.load %arg1[%c206] : memref<221xf32, #tpu.memory_space<smem>>
    %811 = vector.broadcast %810 : f32 to vector<1x128xf32>
    %812 = arith.mulf %450, %811 : vector<1x128xf32>
    %813 = arith.addf %809, %812 : vector<1x128xf32>
    %c207 = arith.constant 207 : index
    %814 = memref.load %arg1[%c207] : memref<221xf32, #tpu.memory_space<smem>>
    %815 = vector.broadcast %814 : f32 to vector<1x128xf32>
    %816 = arith.mulf %493, %815 : vector<1x128xf32>
    %817 = arith.addf %813, %816 : vector<1x128xf32>
    %c208 = arith.constant 208 : index
    %818 = memref.load %arg1[%c208] : memref<221xf32, #tpu.memory_space<smem>>
    %819 = vector.broadcast %818 : f32 to vector<1x128xf32>
    %820 = arith.mulf %536, %819 : vector<1x128xf32>
    %821 = arith.addf %817, %820 : vector<1x128xf32>
    %c209 = arith.constant 209 : index
    %822 = memref.load %arg1[%c209] : memref<221xf32, #tpu.memory_space<smem>>
    %823 = vector.broadcast %822 : f32 to vector<1x128xf32>
    %824 = arith.mulf %579, %823 : vector<1x128xf32>
    %825 = arith.addf %821, %824 : vector<1x128xf32>
    %c210 = arith.constant 210 : index
    %826 = memref.load %arg1[%c210] : memref<221xf32, #tpu.memory_space<smem>>
    %827 = vector.broadcast %826 : f32 to vector<1x128xf32>
    %828 = arith.mulf %622, %827 : vector<1x128xf32>
    %829 = arith.addf %825, %828 : vector<1x128xf32>
    %c211 = arith.constant 211 : index
    %830 = memref.load %arg1[%c211] : memref<221xf32, #tpu.memory_space<smem>>
    %831 = vector.broadcast %830 : f32 to vector<1x128xf32>
    %832 = arith.mulf %665, %831 : vector<1x128xf32>
    %833 = arith.addf %829, %832 : vector<1x128xf32>
    %c215 = arith.constant 215 : index
    %834 = memref.load %arg1[%c215] : memref<221xf32, #tpu.memory_space<smem>>
    %835 = vector.broadcast %834 : f32 to vector<1x128xf32>
    %836 = arith.addf %833, %835 : vector<1x128xf32>
    %837 = math.tanh %836 : vector<1x128xf32>
    %c216 = arith.constant 216 : index
    %838 = memref.load %arg1[%c216] : memref<221xf32, #tpu.memory_space<smem>>
    %839 = vector.broadcast %838 : f32 to vector<1x128xf32>
    %840 = arith.mulf %708, %839 : vector<1x128xf32>
    %c217 = arith.constant 217 : index
    %841 = memref.load %arg1[%c217] : memref<221xf32, #tpu.memory_space<smem>>
    %842 = vector.broadcast %841 : f32 to vector<1x128xf32>
    %843 = arith.mulf %751, %842 : vector<1x128xf32>
    %844 = arith.addf %840, %843 : vector<1x128xf32>
    %c218 = arith.constant 218 : index
    %845 = memref.load %arg1[%c218] : memref<221xf32, #tpu.memory_space<smem>>
    %846 = vector.broadcast %845 : f32 to vector<1x128xf32>
    %847 = arith.mulf %794, %846 : vector<1x128xf32>
    %848 = arith.addf %844, %847 : vector<1x128xf32>
    %c219 = arith.constant 219 : index
    %849 = memref.load %arg1[%c219] : memref<221xf32, #tpu.memory_space<smem>>
    %850 = vector.broadcast %849 : f32 to vector<1x128xf32>
    %851 = arith.mulf %837, %850 : vector<1x128xf32>
    %852 = arith.addf %848, %851 : vector<1x128xf32>
    %c220 = arith.constant 220 : index
    %853 = memref.load %arg1[%c220] : memref<221xf32, #tpu.memory_space<smem>>
    %854 = vector.broadcast %853 : f32 to vector<1x128xf32>
    %855 = arith.addf %852, %854 : vector<1x128xf32>
    %c0_4 = arith.constant 0 : index
    %c0_5 = arith.constant 0 : index
    %856 = vector.load %arg3[%c0_4, %c0_5] : memref<1x128xf32, #tpu.memory_space<vmem>>, vector<1x128xf32>
    tpu.vector_store %arg3[%c0_4, %c0_5], %855 {strides = array<i32>} : memref<1x128xf32, #tpu.memory_space<vmem>>, vector<1x128xf32>,
    return
  }
  func.func @transform_0(%arg0: i32) -> i32 {
    %c0_i32 = arith.constant 0 : i32
    %c0_i32_0 = arith.constant 0 : i32
    return %c0_i32 : i32
  }
  func.func @transform_1(%arg0: i32) -> (i32, i32) {
    %c0_i32 = arith.constant 0 : i32
    %c0_i32_0 = arith.constant 0 : i32
    return %c0_i32, %arg0 : i32, i32
  }
  func.func @transform_2(%arg0: i32) -> (i32, i32) {
    %c0_i32 = arith.constant 0 : i32
    %c0_i32_0 = arith.constant 0 : i32
    return %c0_i32, %arg0 : i32, i32
  }
}

</mosaic_0001>

<bundles_post_ra>
// kernel: tpu_custom_call.1
= control target key start
LH: loop header
LB: loop body
LE: loop exit
PB: predicated region body
PF: predicated region fallthrough
CT: control target
= control target key end

     0   :  { %7 = vsyncpa [#allocation4], 0  ;;  %s2121_s0 = inlined_call_operand.hbm [shape: f32[221], index: 0, kind: input, shape index: {}]   ;;  %s2122_s1 = inlined_call_operand.vmem [shape: f32[2,128], index: 1, kind: input, shape index: {}]   ;;  %s2123_s2 = inlined_call_operand.hbm [shape: f32[1,128], index: 2, kind: output, shape index: {}]  }
   0x1   :  { %8 = vsyncpa [#allocation3], 0  ;;  %s1173_s11 = scalar_lea.hbm %s2121_s0, 32 }
   0x2   :  { %p1174_p0 = scmp.ne.s32.totalorder %s2121_s0, %s1173_s11  ;;  %p1177_p1 = scmp.lt.u32.totalorder %s1173_s11, %s2121_s0 }
   0x4   :  { %p1179_p2 = pnand %p1177_p1, %p1174_p0 }
   0x6   :  { %1182 = shalt.err (!%p1179_p2)
}
   0x7   :  { %s1209_s16 = smov [#allocation2]  }
   0x8   :  { %16 = dma.hbm_to_smem %s2121_s0, 32, %s1209_s16, [#allocation4]  }
   0x9   :  { %1205 = dma.done.wait [#allocation4], 32  }
   0xa   :  { %1206 = vsyncadd [#allocation4], 4294967264 }
   0xb   :  { %22 = sfence }
   0xc   :  { %s25_s19 = sld [smem:[#allocation2]]  ;;  %s895_s20 = sld [smem:[#allocation2 + $0x1]]  ;;  %v23_v0 = vld [vmem:[%s2122_s1] sm:$0x1]  ;;  %v24_v1 = vld [vmem:[%s2122_s1 + $0x1] sm:$0x1] }
   0xd   :  { %s1238_s21 = sld [smem:[#allocation2 + $0x8]]  ;;  %s897_s22 = sld [smem:[#allocation2 + $0x2]] }
   0xe   :  { %s898_s23 = sld [smem:[#allocation2 + $0x3]]  ;;  %s1240_s24 = sld [smem:[#allocation2 + $0x9]] }
   0xf   :  { %s900_s25 = sld [smem:[#allocation2 + $0x4]]  ;;  %s901_s28 = sld [smem:[#allocation2 + $0x5]] }
  0x10   :  { %s1245_s29 = sld [smem:[#allocation2 + $0xa]]  ;;  %s1250_s3 = sld [smem:[#allocation2 + $0x6]] }
  0x11   :  { %s1252_s4 = sld [smem:[#allocation2 + $0x7]]  ;;  %s1254_s5 = sld [smem:[#allocation2 + $0xb]] }
  0x12   :  { %v26_v2 = vstv %s25_s19  ;;  %s1256_s6 = sld [smem:[#allocation2 + $0xc]]  ;;  %v29_v4 = vstv %s895_s20  ;;  %s1258_s7 = sld [smem:[#allocation2 + $0xd]] }
  0x13   :  { %v27_v3 = vmul.f32 %v26_v2, %v23_v0  ;;  %s1260_s8 = sld [smem:[#allocation2 + $0xe]]  ;;  %v30_v5 = vmul.f32 %v29_v4, %v24_v1  ;;  %v37_v6 = vstv %s897_s22  ;;  %s1262_s1 = sld [smem:[#allocation2 + $0xf]]  ;;  %v33_v8 = vstv %s1238_s21 }
  0x14   :  { %v40_v7 = vstv %s898_s23  ;;  %s1264_s9 = sld [smem:[#allocation2 + $0x34]]  ;;  %v38_v9 = vmul.f32 %v37_v6, %v23_v0  ;;  %s1267_s10 = sld [smem:[#allocation2 + $0x10]]  ;;  %v44_v13 = vstv %s1240_s24 }
  0x15   :  { %v41_v10 = vmul.f32 %v40_v7, %v24_v1  ;;  %v48_v11 = vstv %s900_s25  ;;  %s1269_s11 = sld [smem:[#allocation2 + $0x11]]  ;;  %v31_v12 = vadd.f32 %v30_v5, %v27_v3  ;;  %v51_v15 = vstv %s901_s28  ;;  %s1272_s12 = sld [smem:[#allocation2 + $0x12]] }
  0x16   :  { %v49_v14 = vmul.f32 %v48_v11, %v23_v0  ;;  %s1274_s13 = sld [smem:[#allocation2 + $0x13]]  ;;  %v52_v17 = vmul.f32 %v51_v15, %v24_v1  ;;  %v59_v18 = vstv %s1250_s3  ;;  %s1278_s14 = sld [smem:[#allocation2 + $0x35]]  ;;  %v55_v21 = vstv %s1245_s29 }
  0x17   :  { %v42_v16 = vadd.f32 %v41_v10, %v38_v9  ;;  %v62_v19 = vstv %s1252_s4  ;;  %s1280_s15 = sld [smem:[#allocation2 + $0x14]]  ;;  %v34_v20 = vadd.f32 %v33_v8, %v31_v12  ;;  %v60_v22 = vmul.f32 %v59_v18, %v23_v0  ;;  %s1283_s16 = sld [smem:[#allocation2 + $0x15]] }
  0x18   :  { %v63_v23 = vmul.f32 %v62_v19, %v24_v1  ;;  %s1285_s17 = sld [smem:[#allocation2 + $0x16]]  ;;  %v53_v25 = vadd.f32 %v52_v17, %v49_v14  ;;  %v66_v26 = vstv %s1254_s5  ;;  %s1288_s18 = sld [smem:[#allocation2 + $0x17]]  ;;  %v70_v30 = vstv %s1256_s6 }
  0x19   :  { %v45_v24 = vadd.f32 %v44_v13, %v42_v16  ;;  %s1290_s19 = sld [smem:[#allocation2 + $0x36]]  ;;  %1117 = vtanh.f32 %v34_v20  ;;  %s1292_s20 = sld [smem:[#allocation2 + $0x18]]  ;;  %v73_v31 = vstv %s1258_s7  ;;  %v77_v32 = vstv %s1260_s8 }
  0x1a   :  { %v64_v27 = vadd.f32 %v63_v23, %v60_v22  ;;  %s1294_s21 = sld [smem:[#allocation2 + $0x19]]  ;;  %v56_v28 = vadd.f32 %v55_v21, %v53_v25  ;;  %s1296_s22 = sld [smem:[#allocation2 + $0x1a]]  ;;  %v81_v33 = vstv %s1262_s1  ;;  %v85_v34 = vstv %s1264_s9 }
  0x1b   :  { %1119 = vtanh.f32 %v45_v24  ;;  %s1298_s23 = sld [smem:[#allocation2 + $0x1b]]  ;;  %s1300_s24 = sld [smem:[#allocation2 + $0x37]]  ;;  %v89_v35 = vstv %s1267_s10  ;;  %v92_v36 = vstv %s1269_s11  ;;  %v96_v37 = vstv %s1272_s12 }
  0x1c   :  { %v67_v29 = vadd.f32 %v66_v26, %v64_v27  ;;  %s1302_s25 = sld [smem:[#allocation2 + $0x1c]]  ;;  %1121 = vtanh.f32 %v56_v28  ;;  %s1304_s26 = sld [smem:[#allocation2 + $0x1d]]  ;;  %v100_v38 = vstv %s1274_s13  ;;  %v104_v39 = vstv %s1278_s14 }
  0x1d   :  { %s1306_s27 = sld [smem:[#allocation2 + $0x1e]]  ;;  %s1309_s28 = sld [smem:[#allocation2 + $0x1f]]  ;;  %v108_v40 = vstv %s1280_s15  ;;  %v111_v41 = vstv %s1283_s16 }
  0x1e   :  { %1123 = vtanh.f32 %v67_v29  ;;  %s1311_s29 = sld [smem:[#allocation2 + $0x38]]  ;;  %s1319_s30 = sld [smem:[#allocation2 + $0x21]]  ;;  %v115_v42 = vstv %s1285_s17  ;;  %v119_v43 = vstv %s1288_s18 }
  0x1f   :  { %s1317_s0 = sld [smem:[#allocation2 + $0x20]]  ;;  %v123_v44 = vstv %s1290_s19  ;;  %v127_v45 = vstv %s1292_s20  ;;  %s1353_s3 = sld [smem:[#allocation2 + $0x22]] }
  0x20   :  { %v130_v46 = vstv %s1294_s21  ;;  %v134_v47 = vstv %s1296_s22  ;;  %s1365_s4 = sld [smem:[#allocation2 + $0x23]]  ;;  %s1367_s5 = sld [smem:[#allocation2 + $0x39]] }
  0x21   :  { %v138_v48 = vstv %s1298_s23  ;;  %v142_v49 = vstv %s1300_s24  ;;  %s1373_s6 = sld [smem:[#allocation2 + $0x24]]  ;;  %s1375_s7 = sld [smem:[#allocation2 + $0x25]] }
  0x22   :  { %v146_v50 = vstv %s1302_s25  ;;  %v149_v52 = vstv %s1304_s26  ;;  %s1379_s8 = sld [smem:[#allocation2 + $0x26]]  ;;  %s1383_s1 = sld [smem:[#allocation2 + $0x27]] }
  0x23   :  { %v1337_v51 = vpop.eup %1117  ;;  %v153_v53 = vstv %s1306_s27  ;;  %v157_v54 = vstv %s1309_s28  ;;  %s1385_s10 = sld [smem:[#allocation2 + $0x3a]]  ;;  %s1389_s11 = sld [smem:[#allocation2 + $0x28]] }
  0x24   :  { %v161_v55 = vstv %s1311_s29  ;;  %v71_v57 = vmul.f32 %v1337_v51, %v70_v30  ;;  %v90_v58 = vmul.f32 %v1337_v51, %v89_v35  ;;  %v109_v59 = vmul.f32 %v1337_v51, %v108_v40  ;;  %s1391_s12 = sld [smem:[#allocation2 + $0x29]]  ;;  %s1398_s13 = sld [smem:[#allocation2 + $0x2a]] }
  0x25   :  { %v1343_v56 = vpop.eup %1119  ;;  %v128_v60 = vmul.f32 %v1337_v51, %v127_v45  ;;  %v147_v2 = vmul.f32 %v1337_v51, %v146_v50  ;;  %v165_v4 = vstv %s1317_s0  ;;  %v168_v5 = vstv %s1319_s30  ;;  %s1400_s15 = sld [smem:[#allocation2 + $0x2b]]  ;;  %s1409_s14 = sld [smem:[#allocation2 + $0x2c]] }
  0x26   :  { %v74_v61 = vmul.f32 %v1343_v56, %v73_v31  ;;  %v93_v62 = vmul.f32 %v1343_v56, %v92_v36  ;;  %v112_v63 = vmul.f32 %v1343_v56, %v111_v41  ;;  %v131_v0 = vmul.f32 %v1343_v56, %v130_v46  ;;  %v1355_v1 = vpop.eup %1121  ;;  %s1407_s9 = sld [smem:[#allocation2 + $0x3b]]  ;;  %s1414_s16 = sld [smem:[#allocation2 + $0x2d]] }
  0x27   :  { %v150_v3 = vmul.f32 %v1343_v56, %v149_v52  ;;  %v78_v8 = vmul.f32 %v1355_v1, %v77_v32  ;;  %v97_v10 = vmul.f32 %v1355_v1, %v96_v37  ;;  %v116_v14 = vmul.f32 %v1355_v1, %v115_v42  ;;  %s1416_s17 = sld [smem:[#allocation2 + $0x2e]]  ;;  %s1422_s18 = sld [smem:[#allocation2 + $0x2f]] }
  0x28   :  { %v1361_v6 = vpop.eup %1123  ;;  %v75_v7 = vadd.f32 %v74_v61, %v71_v57  ;;  %v94_v9 = vadd.f32 %v93_v62, %v90_v58  ;;  %v113_v13 = vadd.f32 %v112_v63, %v109_v59  ;;  %v132_v18 = vadd.f32 %v131_v0, %v128_v60  ;;  %s1424_s19 = sld [smem:[#allocation2 + $0x3c]]  ;;  %s1428_s20 = sld [smem:[#allocation2 + $0x30]] }
  0x29   :  { %v82_v11 = vmul.f32 %v1361_v6, %v81_v33  ;;  %v101_v12 = vmul.f32 %v1361_v6, %v100_v38  ;;  %v120_v17 = vmul.f32 %v1361_v6, %v119_v43  ;;  %v135_v20 = vmul.f32 %v1355_v1, %v134_v47  ;;  %s1433_s21 = sld [smem:[#allocation2 + $0x31]]  ;;  %s1435_s22 = sld [smem:[#allocation2 + $0x32]] }
  0x2a   :  { %v79_v15 = vadd.f32 %v78_v8, %v75_v7  ;;  %v98_v16 = vadd.f32 %v97_v10, %v94_v9  ;;  %v117_v19 = vadd.f32 %v116_v14, %v113_v13  ;;  %v139_v21 = vmul.f32 %v1361_v6, %v138_v48  ;;  %s1443_s23 = sld [smem:[#allocation2 + $0x33]]  ;;  %s1445_s24 = sld [smem:[#allocation2 + $0x3d]] }
  0x2b   :  { %v151_v22 = vadd.f32 %v150_v3, %v147_v2  ;;  %v154_v25 = vmul.f32 %v1355_v1, %v153_v53  ;;  %v158_v26 = vmul.f32 %v1361_v6, %v157_v54  ;;  %v136_v28 = vadd.f32 %v135_v20, %v132_v18  ;;  %s1449_s25 = sld [smem:[#allocation2 + $0x3e]]  ;;  %s1455_s26 = sld [smem:[#allocation2 + $0x3f]] }
  0x2c   :  { %v83_v23 = vadd.f32 %v82_v11, %v79_v15  ;;  %v102_v24 = vadd.f32 %v101_v12, %v98_v16  ;;  %v121_v27 = vadd.f32 %v120_v17, %v117_v19  ;;  %v166_v29 = vmul.f32 %v1337_v51, %v165_v4  ;;  %s1457_s27 = sld [smem:[#allocation2 + $0x40]]  ;;  %s1461_s28 = sld [smem:[#allocation2 + $0x41]] }
  0x2d   :  { %v169_v30 = vmul.f32 %v1343_v56, %v168_v5  ;;  %v155_v33 = vadd.f32 %v154_v25, %v151_v22  ;;  %v172_v35 = vstv %s1353_s3  ;;  %v140_v37 = vadd.f32 %v139_v21, %v136_v28  ;;  %s1469_s29 = sld [smem:[#allocation2 + $0x42]]  ;;  %s1471_s0 = sld [smem:[#allocation2 + $0x43]] }
  0x2e   :  { %v86_v31 = vadd.f32 %v85_v34, %v83_v23  ;;  %v105_v32 = vadd.f32 %v104_v39, %v102_v24  ;;  %v124_v36 = vadd.f32 %v123_v44, %v121_v27  ;;  %v173_v40 = vmul.f32 %v1355_v1, %v172_v35  ;;  %s1486_s30 = sld [smem:[#allocation2 + $0x44]]  ;;  %s1488_s3 = sld [smem:[#allocation2 + $0x48]] }
  0x2f   :  { %v170_v38 = vadd.f32 %v169_v30, %v166_v29  ;;  %v159_v34 = vadd.f32 %v158_v26, %v155_v33  ;;  %v176_v41 = vstv %s1365_s4  ;;  %v180_v39 = vstv %s1367_s5  ;;  %s1495_s4 = sld [smem:[#allocation2 + $0x49]]  ;;  %s1497_s5 = sld [smem:[#allocation2 + $0x4a]] }
  0x30   :  { %1125 = vtanh.f32 %v86_v31  ;;  %v143_v42 = vadd.f32 %v142_v49, %v140_v37  ;;  %v177_v44 = vmul.f32 %v1361_v6, %v176_v41  ;;  %v184_v46 = vstv %s1373_s6  ;;  %s1501_s6 = sld [smem:[#allocation2 + $0x45]] }
  0x31   :  { %1127 = vtanh.f32 %v105_v32  ;;  %v174_v43 = vadd.f32 %v173_v40, %v170_v38  ;;  %v162_v45 = vadd.f32 %v161_v55, %v159_v34  ;;  %v187_v47 = vstv %s1375_s7  ;;  %s1506_s7 = sld [smem:[#allocation2 + $0x4b]] }
  0x32   :  { %1129 = vtanh.f32 %v124_v36  ;;  %v185_v49 = vmul.f32 %v1337_v51, %v184_v46  ;;  %v188_v50 = vmul.f32 %v1343_v56, %v187_v47  ;;  %v191_v52 = vstv %s1379_s8  ;;  %s1508_s8 = sld [smem:[#allocation2 + $0x4c]] }
  0x33   :  { %1131 = vtanh.f32 %v143_v42  ;;  %v178_v48 = vadd.f32 %v177_v44, %v174_v43  ;;  %v195_v53 = vstv %s1383_s1  ;;  %v199_v54 = vstv %s1385_s10  ;;  %s1514_s1 = sld [smem:[#allocation2 + $0x46]]  ;;  %s1516_s10 = sld [smem:[#allocation2 + $0x47]] }
  0x34   :  { %1133 = vtanh.f32 %v162_v45  ;;  %v189_v57 = vadd.f32 %v188_v50, %v185_v49  ;;  %v192_v58 = vmul.f32 %v1355_v1, %v191_v52  ;;  %v196_v59 = vmul.f32 %v1361_v6, %v195_v53 }
  0x35   :  { %v181_v55 = vadd.f32 %v180_v39, %v178_v48  ;;  %v203_v60 = vstv %s1389_s11  ;;  %v206_v61 = vstv %s1391_s12  ;;  %v210_v62 = vstv %s1398_s13  ;;  %s1521_s11 = sld [smem:[#allocation2 + $0xa2]]  ;;  %s1523_s12 = sld [smem:[#allocation2 + $0x4d]] }
  0x36   :  { %v214_v63 = vstv %s1400_s15  ;;  %v193_v0 = vadd.f32 %v192_v58, %v189_v57  ;;  %v204_v2 = vmul.f32 %v1337_v51, %v203_v60  ;;  %v207_v3 = vmul.f32 %v1343_v56, %v206_v61  ;;  %s1526_s13 = sld [smem:[#allocation2 + $0x4e]]  ;;  %s1528_s15 = sld [smem:[#allocation2 + $0x4f]] }
  0x37   :  { %1135 = vtanh.f32 %v181_v55  ;;  %v211_v4 = vmul.f32 %v1355_v1, %v210_v62  ;;  %v215_v5 = vmul.f32 %v1361_v6, %v214_v63  ;;  %v218_v7 = vstv %s1407_s9  ;;  %s1530_s9 = sld [smem:[#allocation2 + $0x50]] }
  0x38   :  { %v222_v8 = vstv %s1409_s14  ;;  %v197_v9 = vadd.f32 %v196_v59, %v193_v0  ;;  %v208_v10 = vadd.f32 %v207_v3, %v204_v2  ;;  %v225_v12 = vstv %s1414_s16  ;;  %s1534_s14 = sld [smem:[#allocation2 + $0x52]]  ;;  %s1536_s16 = sld [smem:[#allocation2 + $0x53]] }
  0x39   :  { %v223_v11 = vmul.f32 %v1337_v51, %v222_v8  ;;  %v226_v14 = vmul.f32 %v1343_v56, %v225_v12  ;;  %v229_v15 = vstv %s1416_s17  ;;  %v233_v16 = vstv %s1422_s18  ;;  %s1542_s17 = sld [smem:[#allocation2 + $0x54]]  ;;  %s1544_s18 = sld [smem:[#allocation2 + $0x55]] }
  0x3a   :  { %v1463_v13 = vpop.eup %1125  ;;  %v237_v17 = vstv %s1424_s19  ;;  %v200_v19 = vadd.f32 %v199_v54, %v197_v9  ;;  %v212_v20 = vadd.f32 %v211_v4, %v208_v10  ;;  %v230_v21 = vmul.f32 %v1355_v1, %v229_v15  ;;  %s1554_s19 = sld [smem:[#allocation2 + $0x56]] }
  0x3b   :  { %v1473_v18 = vpop.eup %1127  ;;  %v234_v22 = vmul.f32 %v1361_v6, %v233_v16  ;;  %v227_v24 = vadd.f32 %v226_v14, %v223_v11  ;;  %v241_v25 = vstv %s1428_s20  ;;  %v244_v26 = vstv %s1433_s21  ;;  %s1558_s20 = sld [smem:[#allocation2 + $0x57]]  ;;  %s1564_s21 = sld [smem:[#allocation2 + $0x51]] }
  0x3c   :  { %v1477_v23 = vpop.eup %1129  ;;  %v248_v27 = vstv %s1435_s22  ;;  %1137 = vtanh.f32 %v200_v19  ;;  %v216_v29 = vadd.f32 %v215_v5, %v212_v20  ;;  %v242_v30 = vmul.f32 %v1337_v51, %v241_v25  ;;  %s1570_s22 = sld [smem:[#allocation2 + $0x58]] }
  0x3d   :  { %v1482_v28 = vpop.eup %1131  ;;  %v245_v31 = vmul.f32 %v1343_v56, %v244_v26  ;;  %v231_v33 = vadd.f32 %v230_v21, %v227_v24  ;;  %v249_v35 = vmul.f32 %v1355_v1, %v248_v27  ;;  %v252_v36 = vstv %s1443_s23  ;;  %s1572_s23 = sld [smem:[#allocation2 + $0x59]] }
  0x3e   :  { %v1490_v32 = vpop.eup %1133  ;;  %v256_v37 = vstv %s1445_s24  ;;  %v219_v51 = vadd.f32 %v218_v7, %v216_v29  ;;  %v253_v56 = vmul.f32 %v1361_v6, %v252_v36  ;;  %v260_v40 = vstv %s1449_s25  ;;  %s1578_s24 = sld [smem:[#allocation2 + $0xa3]]  ;;  %s1582_s25 = sld [smem:[#allocation2 + $0x5a]] }
  0x3f   :  { %v246_v38 = vadd.f32 %v245_v31, %v242_v30  ;;  %v235_v34 = vadd.f32 %v234_v22, %v231_v33  ;;  %v261_v41 = vmul.f32 %v1463_v13, %v260_v40  ;;  %v263_v1 = vstv %s1455_s26  ;;  %s1590_s26 = sld [smem:[#allocation2 + $0x5b]] }
  0x40   :  { %v267_v39 = vstv %s1457_s27  ;;  %1139 = vtanh.f32 %v219_v51  ;;  %v264_v6 = vmul.f32 %v1473_v18, %v263_v1  ;;  %v271_v46 = vstv %s1461_s28  ;;  %s1592_s27 = sld [smem:[#allocation2 + $0x5c]]  ;;  %s1596_s28 = sld [smem:[#allocation2 + $0x5d]] }
  0x41   :  { %v1510_v42 = vpop.eup %1135  ;;  %v250_v43 = vadd.f32 %v249_v35, %v246_v38  ;;  %v268_v44 = vmul.f32 %v1477_v23, %v267_v39  ;;  %v238_v45 = vadd.f32 %v237_v17, %v235_v34  ;;  %v275_v47 = vstv %s1469_s29  ;;  %s1598_s29 = sld [smem:[#allocation2 + $0x5e]] }
  0x42   :  { %v279_v48 = vstv %s1471_s0  ;;  %v265_v50 = vadd.f32 %v264_v6, %v261_v41  ;;  %v272_v52 = vmul.f32 %v1482_v28, %v271_v46  ;;  %v276_v55 = vmul.f32 %v1490_v32, %v275_v47  ;;  %s1607_s0 = sld [smem:[#allocation2 + $0x5f]] }
  0x43   :  { %v254_v49 = vadd.f32 %v253_v56, %v250_v43  ;;  %1141 = vtanh.f32 %v238_v45  ;;  %v280_v57 = vmul.f32 %v1510_v42, %v279_v48  ;;  %v283_v58 = vstv %s1486_s30  ;;  %s1609_s30 = sld [smem:[#allocation2 + $0x60]] }
  0x44   :  { %v269_v54 = vadd.f32 %v268_v44, %v265_v50  ;;  %v303_v59 = vstv %s1488_s3  ;;  %v306_v60 = vstv %s1495_s4  ;;  %v310_v61 = vstv %s1497_s5  ;;  %s1614_s3 = sld [smem:[#allocation2 + $0xa4]]  ;;  %s1616_s4 = sld [smem:[#allocation2 + $0x61]] }
  0x45   :  { %v257_v53 = vadd.f32 %v256_v37, %v254_v49  ;;  %v304_v0 = vmul.f32 %v1463_v13, %v303_v59  ;;  %v307_v2 = vmul.f32 %v1473_v18, %v306_v60  ;;  %v287_v3 = vstv %s1501_s6  ;;  %s1621_s5 = sld [smem:[#allocation2 + $0x62]]  ;;  %s1623_s6 = sld [smem:[#allocation2 + $0x63]] }
  0x46   :  { %v1546_v62 = vpop.eup %1137  ;;  %v273_v63 = vadd.f32 %v272_v52, %v269_v54  ;;  %v311_v4 = vmul.f32 %v1477_v23, %v310_v61  ;;  %v314_v5 = vstv %s1506_s7  ;;  %v318_v7 = vstv %s1508_s8  ;;  %s1630_s7 = sld [smem:[#allocation2 + $0x64]]  ;;  %s1632_s8 = sld [smem:[#allocation2 + $0x65]] }
  0x47   :  { %1143 = vtanh.f32 %v257_v53  ;;  %v284_v9 = vmul.f32 %v1546_v62, %v283_v58  ;;  %v308_v10 = vadd.f32 %v307_v2, %v304_v0  ;;  %v315_v11 = vmul.f32 %v1482_v28, %v314_v5 }
  0x48   :  { %v277_v8 = vadd.f32 %v276_v55, %v273_v63  ;;  %v291_v12 = vstv %s1514_s1  ;;  %v295_v14 = vstv %s1516_s10  ;;  %v299_v15 = vstv %s1521_s11  ;;  %s1637_s1 = sld [smem:[#allocation2 + $0x66]]  ;;  %s1639_s10 = sld [smem:[#allocation2 + $0x67]] }
  0x49   :  { %v322_v16 = vstv %s1523_s12  ;;  %v312_v20 = vadd.f32 %v311_v4, %v308_v10  ;;  %v319_v21 = vmul.f32 %v1490_v32, %v318_v7  ;;  %v326_v22 = vstv %s1526_s13  ;;  %s1644_s12 = sld [smem:[#allocation2 + $0x68]]  ;;  %s1646_s13 = sld [smem:[#allocation2 + $0x69]] }
  0x4a   :  { %v1566_v17 = vpop.eup %1139  ;;  %v281_v19 = vadd.f32 %v280_v57, %v277_v8  ;;  %v323_v25 = vmul.f32 %v1510_v42, %v322_v16  ;;  %v330_v26 = vstv %s1528_s15  ;;  %v334_v27 = vstv %s1530_s9  ;;  %s1655_s15 = sld [smem:[#allocation2 + $0x6a]]  ;;  %s1657_s9 = sld [smem:[#allocation2 + $0x6b]] }
  0x4b   :  { %v288_v24 = vmul.f32 %v1566_v17, %v287_v3  ;;  %v316_v30 = vadd.f32 %v315_v11, %v312_v20  ;;  %v346_v31 = vstv %s1534_s14  ;;  %v349_v33 = vstv %s1536_s16  ;;  %s1665_s11 = sld [smem:[#allocation2 + $0xa5]]  ;;  %s1667_s14 = sld [smem:[#allocation2 + $0x6c]] }
  0x4c   :  { %v285_v29 = vadd.f32 %v284_v9, %v281_v19  ;;  %v347_v36 = vmul.f32 %v1463_v13, %v346_v31  ;;  %v350_v37 = vmul.f32 %v1473_v18, %v349_v33  ;;  %v353_v51 = vstv %s1542_s17  ;;  %s1670_s16 = sld [smem:[#allocation2 + $0x6d]]  ;;  %s1675_s17 = sld [smem:[#allocation2 + $0x6e]] }
  0x4d   :  { %v1584_v35 = vpop.eup %1141  ;;  %v357_v38 = vstv %s1544_s18  ;;  %v320_v34 = vadd.f32 %v319_v21, %v316_v30  ;;  %v327_v41 = vmul.f32 %v1546_v62, %v326_v22  ;;  %v354_v39 = vmul.f32 %v1477_v23, %v353_v51  ;;  %s1677_s18 = sld [smem:[#allocation2 + $0x6f]] }
  0x4e   :  { %v289_v56 = vadd.f32 %v288_v24, %v285_v29  ;;  %v292_v40 = vmul.f32 %v1584_v35, %v291_v12  ;;  %v351_v1 = vadd.f32 %v350_v37, %v347_v36  ;;  %v358_v43 = vmul.f32 %v1482_v28, %v357_v38 }
  0x4f   :  { %v361_v6 = vstv %s1554_s19  ;;  %v324_v46 = vadd.f32 %v323_v25, %v320_v34  ;;  %v331_v47 = vmul.f32 %v1566_v17, %v330_v26  ;;  %v365_v48 = vstv %s1558_s20  ;;  %s1681_s19 = sld [smem:[#allocation2 + $0x70]]  ;;  %s1683_s20 = sld [smem:[#allocation2 + $0x71]] }
  0x50   :  { %v293_v45 = vadd.f32 %v292_v40, %v289_v56  ;;  %v338_v50 = vstv %s1564_s21  ;;  %v355_v52 = vadd.f32 %v354_v39, %v351_v1  ;;  %v362_v53 = vmul.f32 %v1490_v32, %v361_v6  ;;  %s1689_s21 = sld [smem:[#allocation2 + $0x72]] }
  0x51   :  { %v1603_v44 = vpop.eup %1143  ;;  %v328_v54 = vadd.f32 %v327_v41, %v324_v46  ;;  %v335_v55 = vmul.f32 %v1584_v35, %v334_v27  ;;  %v369_v57 = vstv %s1570_s22  ;;  %v373_v58 = vstv %s1572_s23  ;;  %s1691_s22 = sld [smem:[#allocation2 + $0x73]]  ;;  %s1698_s23 = sld [smem:[#allocation2 + $0x74]] }
  0x52   :  { %v296_v49 = vmul.f32 %v1603_v44, %v295_v14  ;;  %v342_v60 = vstv %s1578_s24  ;;  %v359_v61 = vadd.f32 %v358_v43, %v355_v52  ;;  %v366_v63 = vmul.f32 %v1510_v42, %v365_v48  ;;  %s1700_s24 = sld [smem:[#allocation2 + $0x75]] }
  0x53   :  { %v332_v0 = vadd.f32 %v331_v47, %v328_v54  ;;  %v339_v2 = vmul.f32 %v1603_v44, %v338_v50  ;;  %v370_v3 = vmul.f32 %v1546_v62, %v369_v57  ;;  %v377_v4 = vstv %s1582_s25  ;;  %s1703_s25 = sld [smem:[#allocation2 + $0x76]] }
  0x54   :  { %v297_v59 = vadd.f32 %v296_v49, %v293_v45  ;;  %v363_v5 = vadd.f32 %v362_v53, %v359_v61  ;;  %v374_v7 = vmul.f32 %v1566_v17, %v373_v58  ;;  %v381_v8 = vstv %s1590_s26  ;;  %s1709_s26 = sld [smem:[#allocation2 + $0xa6]] }
  0x55   :  { %v389_v9 = vstv %s1592_s27  ;;  %v336_v10 = vadd.f32 %v335_v55, %v332_v0  ;;  %v392_v12 = vstv %s1596_s28  ;;  %v396_v14 = vstv %s1598_s29  ;;  %s1711_s27 = sld [smem:[#allocation2 + $0x77]]  ;;  %s1718_s28 = sld [smem:[#allocation2 + $0x78]] }
  0x56   :  { %v390_v11 = vmul.f32 %v1463_v13, %v389_v9  ;;  %v300_v16 = vadd.f32 %v299_v15, %v297_v59  ;;  %v367_v19 = vadd.f32 %v366_v63, %v363_v5  ;;  %v393_v20 = vmul.f32 %v1473_v18, %v392_v12  ;;  %s1720_s29 = sld [smem:[#allocation2 + $0x7a]] }
  0x57   :  { %v397_v21 = vmul.f32 %v1477_v23, %v396_v14  ;;  %v340_v22 = vadd.f32 %v339_v2, %v336_v10  ;;  %v378_v24 = vmul.f32 %v1584_v35, %v377_v4  ;;  %v400_v25 = vstv %s1607_s0  ;;  %s1726_s0 = sld [smem:[#allocation2 + $0x79]] }
  0x58   :  { %v404_v26 = vstv %s1609_s30  ;;  %v371_v27 = vadd.f32 %v370_v3, %v367_v19  ;;  %v394_v29 = vadd.f32 %v393_v20, %v390_v11  ;;  %v401_v15 = vmul.f32 %v1482_v28, %v400_v25  ;;  %s1728_s30 = sld [smem:[#allocation2 + $0x7b]] }
  0x59   :  { %v408_v30 = vstv %s1616_s4  ;;  %v382_v31 = vmul.f32 %v1603_v44, %v381_v8  ;;  %v385_v33 = vstv %s1614_s3  ;;  %v412_v36 = vstv %s1621_s5  ;;  %s1734_s3 = sld [smem:[#allocation2 + $0x7c]]  ;;  %s1736_s4 = sld [smem:[#allocation2 + $0x7d]] }
  0x5a   :  { %v416_v37 = vstv %s1623_s6  ;;  %1145 = vtanh.f32 %v300_v16  ;;  %v375_v51 = vadd.f32 %v374_v7, %v371_v27  ;;  %v398_v38 = vadd.f32 %v397_v21, %v394_v29  ;;  %s1744_s5 = sld [smem:[#allocation2 + $0x7e]]  ;;  %s1746_s6 = sld [smem:[#allocation2 + $0x7f]] }
  0x5b   :  { %v405_v56 = vmul.f32 %v1490_v32, %v404_v26  ;;  %v343_v40 = vadd.f32 %v342_v60, %v340_v22  ;;  %v409_v34 = vmul.f32 %v1510_v42, %v408_v30  ;;  %v413_v41 = vmul.f32 %v1546_v62, %v412_v36 }
  0x5c   :  { %v417_v1 = vmul.f32 %v1566_v17, %v416_v37  ;;  %v379_v39 = vadd.f32 %v378_v24, %v375_v51  ;;  %v402_v43 = vadd.f32 %v401_v15, %v398_v38  ;;  %v420_v6 = vstv %s1630_s7  ;;  %s1749_s7 = sld [smem:[#allocation2 + $0x80]] }
  0x5d   :  { %v424_v45 = vstv %s1632_s8  ;;  %v432_v46 = vstv %s1637_s1  ;;  %v435_v47 = vstv %s1639_s10  ;;  %v439_v48 = vstv %s1644_s12  ;;  %s1757_s8 = sld [smem:[#allocation2 + $0xa7]]  ;;  %s1759_s1 = sld [smem:[#allocation2 + $0x81]] }
  0x5e   :  { %v443_v49 = vstv %s1646_s13  ;;  %v383_v50 = vadd.f32 %v382_v31, %v379_v39  ;;  %v406_v52 = vadd.f32 %v405_v56, %v402_v43  ;;  %v433_v53 = vmul.f32 %v1463_v13, %v432_v46  ;;  %s1766_s10 = sld [smem:[#allocation2 + $0x82]]  ;;  %s1768_s12 = sld [smem:[#allocation2 + $0x84]] }
  0x5f   :  { %v436_v54 = vmul.f32 %v1473_v18, %v435_v47  ;;  %1147 = vtanh.f32 %v343_v40  ;;  %v440_v55 = vmul.f32 %v1477_v23, %v439_v48  ;;  %v447_v57 = vstv %s1655_s15  ;;  %s1772_s13 = sld [smem:[#allocation2 + $0x83]]  ;;  %s1774_s15 = sld [smem:[#allocation2 + $0x85]] }
  0x60   :  { %v451_v58 = vstv %s1657_s9  ;;  %v386_v59 = vadd.f32 %v385_v33, %v383_v50  ;;  %v410_v60 = vadd.f32 %v409_v34, %v406_v52  ;;  %v444_v63 = vmul.f32 %v1482_v28, %v443_v49  ;;  %s1782_s9 = sld [smem:[#allocation2 + $0x86]] }
  0x61   :  { %v437_v61 = vadd.f32 %v436_v54, %v433_v53  ;;  %v421_v0 = vmul.f32 %v1584_v35, %v420_v6  ;;  %v425_v2 = vmul.f32 %v1603_v44, %v424_v45  ;;  %v428_v3 = vstv %s1665_s11  ;;  %s1784_s11 = sld [smem:[#allocation2 + $0x87]] }
  0x62   :  { %v455_v4 = vstv %s1667_s14  ;;  %v414_v5 = vadd.f32 %v413_v41, %v410_v60  ;;  %v448_v8 = vmul.f32 %v1490_v32, %v447_v57  ;;  %v452_v9 = vmul.f32 %v1510_v42, %v451_v58  ;;  %s1792_s14 = sld [smem:[#allocation2 + $0x88]] }
  0x63   :  { %v441_v7 = vadd.f32 %v440_v55, %v437_v61  ;;  %1149 = vtanh.f32 %v386_v59  ;;  %v456_v10 = vmul.f32 %v1546_v62, %v455_v4  ;;  %v459_v11 = vstv %s1670_s16  ;;  %s1794_s16 = sld [smem:[#allocation2 + $0x89]] }
  0x64   :  { %v463_v12 = vstv %s1675_s17  ;;  %v1722_v14 = vpop.eup %1145  ;;  %v418_v16 = vadd.f32 %v417_v1, %v414_v5  ;;  %v467_v20 = vstv %s1677_s18  ;;  %v475_v21 = vstv %s1681_s19  ;;  %s1797_s17 = sld [smem:[#allocation2 + $0x8a]]  ;;  %s1802_s18 = sld [smem:[#allocation2 + $0xa8]] }
  0x65   :  { %v445_v19 = vadd.f32 %v444_v63, %v441_v7  ;;  %v476_v22 = vmul.f32 %v1463_v13, %v475_v21  ;;  %v478_v24 = vstv %s1683_s20  ;;  %v482_v25 = vstv %s1689_s21  ;;  %s1804_s19 = sld [smem:[#allocation2 + $0x8b]]  ;;  %s1811_s20 = sld [smem:[#allocation2 + $0x8c]] }
  0x66   :  { %v486_v26 = vstv %s1691_s22  ;;  %v422_v27 = vadd.f32 %v421_v0, %v418_v16  ;;  %v479_v15 = vmul.f32 %v1473_v18, %v478_v24  ;;  %v483_v30 = vmul.f32 %v1477_v23, %v482_v25  ;;  %s1813_s21 = sld [smem:[#allocation2 + $0x8e]]  ;;  %s1817_s22 = sld [smem:[#allocation2 + $0x8d]] }
  0x67   :  { %v449_v29 = vadd.f32 %v448_v8, %v445_v19  ;;  %v460_v31 = vmul.f32 %v1566_v17, %v459_v11  ;;  %v487_v33 = vmul.f32 %v1482_v28, %v486_v26  ;;  %v490_v36 = vstv %s1698_s23  ;;  %s1819_s23 = sld [smem:[#allocation2 + $0x8f]] }
  0x68   :  { %v494_v37 = vstv %s1700_s24  ;;  %v426_v51 = vadd.f32 %v425_v2, %v422_v27  ;;  %v480_v56 = vadd.f32 %v479_v15, %v476_v22  ;;  %v498_v40 = vstv %s1703_s25  ;;  %s1825_s24 = sld [smem:[#allocation2 + $0x90]]  ;;  %s1827_s25 = sld [smem:[#allocation2 + $0x91]] }
  0x69   :  { %v453_v38 = vadd.f32 %v452_v9, %v449_v29  ;;  %v1751_v34 = vpop.eup %1147  ;;  %v464_v41 = vmul.f32 %v1584_v35, %v463_v12  ;;  %v468_v1 = vmul.f32 %v1603_v44, %v467_v20  ;;  %v471_v39 = vstv %s1709_s26  ;;  %s1835_s26 = sld [smem:[#allocation2 + $0x92]] }
  0x6a   :  { %v502_v43 = vstv %s1711_s27  ;;  %v484_v45 = vadd.f32 %v483_v30, %v480_v56  ;;  %v491_v46 = vmul.f32 %v1490_v32, %v490_v36  ;;  %v495_v47 = vmul.f32 %v1510_v42, %v494_v37  ;;  %s1837_s27 = sld [smem:[#allocation2 + $0x93]] }
  0x6b   :  { %v457_v6 = vadd.f32 %v456_v10, %v453_v38  ;;  %v429_v48 = vadd.f32 %v428_v3, %v426_v51  ;;  %v499_v49 = vmul.f32 %v1546_v62, %v498_v40  ;;  %v506_v50 = vstv %s1718_s28  ;;  %s1840_s28 = sld [smem:[#allocation2 + $0x94]] }
  0x6c   :  { %v518_v52 = vstv %s1720_s29  ;;  %v488_v54 = vadd.f32 %v487_v33, %v484_v45  ;;  %v503_v55 = vmul.f32 %v1566_v17, %v502_v43  ;;  %v510_v57 = vstv %s1726_s0  ;;  %s1845_s29 = sld [smem:[#allocation2 + $0xa9]]  ;;  %s1847_s0 = sld [smem:[#allocation2 + $0x95]] }
  0x6d   :  { %v461_v53 = vadd.f32 %v460_v31, %v457_v6  ;;  %v1776_v58 = vpop.eup %1149  ;;  %v519_v59 = vmul.f32 %v1463_v13, %v518_v52  ;;  %v521_v60 = vstv %s1728_s30  ;;  %v525_v61 = vstv %s1734_s3  ;;  %s1856_s30 = sld [smem:[#allocation2 + $0x96]]  ;;  %s1858_s3 = sld [smem:[#allocation2 + $0x98]] }
  0x6e   :  { %v529_v63 = vstv %s1736_s4  ;;  %v492_v2 = vadd.f32 %v491_v46, %v488_v54  ;;  %v522_v3 = vmul.f32 %v1473_v18, %v521_v60  ;;  %v526_v4 = vmul.f32 %v1477_v23, %v525_v61  ;;  %s1862_s4 = sld [smem:[#allocation2 + $0x97]] }
  0x6f   :  { %v465_v0 = vadd.f32 %v464_v41, %v461_v53  ;;  %v507_v5 = vmul.f32 %v1584_v35, %v506_v50  ;;  %v530_v7 = vmul.f32 %v1482_v28, %v529_v63  ;;  %v533_v8 = vstv %s1744_s5  ;;  %s1864_s5 = sld [smem:[#allocation2 + $0x99]] }
  0x70   :  { %v537_v9 = vstv %s1746_s6  ;;  %v496_v11 = vadd.f32 %v495_v47, %v492_v2  ;;  %v523_v12 = vadd.f32 %v522_v3, %v519_v59  ;;  %v541_v16 = vstv %s1749_s7  ;;  %s1870_s6 = sld [smem:[#allocation2 + $0x9a]]  ;;  %s1872_s7 = sld [smem:[#allocation2 + $0x9b]] }
  0x71   :  { %v469_v10 = vadd.f32 %v468_v1, %v465_v0  ;;  %1151 = vtanh.f32 %v429_v48  ;;  %v511_v19 = vmul.f32 %v1603_v44, %v510_v57  ;;  %v514_v20 = vstv %s1757_s8  ;;  %s1880_s8 = sld [smem:[#allocation2 + $0x9c]] }
  0x72   :  { %v545_v21 = vstv %s1759_s1  ;;  %v500_v22 = vadd.f32 %v499_v49, %v496_v11  ;;  %v527_v24 = vadd.f32 %v526_v4, %v523_v12  ;;  %v534_v25 = vmul.f32 %v1490_v32, %v533_v8  ;;  %s1882_s1 = sld [smem:[#allocation2 + $0x9d]] }
  0x73   :  { %v538_v26 = vmul.f32 %v1510_v42, %v537_v9  ;;  %v472_v27 = vadd.f32 %v471_v39, %v469_v10  ;;  %v542_v29 = vmul.f32 %v1546_v62, %v541_v16  ;;  %v549_v15 = vstv %s1766_s10  ;;  %s1885_s10 = sld [smem:[#allocation2 + $0x9e]] }
  0x74   :  { %v561_v30 = vstv %s1768_s12  ;;  %v504_v31 = vadd.f32 %v503_v55, %v500_v22  ;;  %v531_v33 = vadd.f32 %v530_v7, %v527_v24  ;;  %v546_v36 = vmul.f32 %v1566_v17, %v545_v21  ;;  %s1892_s12 = sld [smem:[#allocation2 + $0x9f]] }
  0x75   :  { %v553_v37 = vstv %s1772_s13  ;;  %v562_v51 = vmul.f32 %v1463_v13, %v561_v30  ;;  %v564_v38 = vstv %s1774_s15  ;;  %v568_v56 = vstv %s1782_s9  ;;  %s1899_s13 = sld [smem:[#allocation2 + $0xa0]]  ;;  %s1901_s15 = sld [smem:[#allocation2 + $0xac]] }
  0x76   :  { %v572_v40 = vstv %s1784_s11  ;;  %v508_v41 = vadd.f32 %v507_v5, %v504_v31  ;;  %v535_v1 = vadd.f32 %v534_v25, %v531_v33  ;;  %v565_v39 = vmul.f32 %v1473_v18, %v564_v38  ;;  %s1905_s9 = sld [smem:[#allocation2 + $0xa1]]  ;;  %s1907_s11 = sld [smem:[#allocation2 + $0xad]] }
  0x77   :  { %v569_v43 = vmul.f32 %v1477_v23, %v568_v56  ;;  %v550_v6 = vmul.f32 %v1584_v35, %v549_v15  ;;  %v573_v45 = vmul.f32 %v1482_v28, %v572_v40  ;;  %v576_v46 = vstv %s1792_s14  ;;  %s1913_s14 = sld [smem:[#allocation2 + $0xae]] }
  0x78   :  { %v580_v47 = vstv %s1794_s16  ;;  %v512_v48 = vadd.f32 %v511_v19, %v508_v41  ;;  %v539_v49 = vadd.f32 %v538_v26, %v535_v1  ;;  %v566_v50 = vadd.f32 %v565_v39, %v562_v51  ;;  %s1915_s16 = sld [smem:[#allocation2 + $0xaf]] }
  0x79   :  { %v584_v52 = vstv %s1797_s17  ;;  %1153 = vtanh.f32 %v472_v27  ;;  %v554_v53 = vmul.f32 %v1603_v44, %v553_v37  ;;  %v557_v54 = vstv %s1802_s18  ;;  %s1919_s17 = sld [smem:[#allocation2 + $0xaa]]  ;;  %s1924_s18 = sld [smem:[#allocation2 + $0xb0]] }
  0x7a   :  { %v588_v55 = vstv %s1804_s19  ;;  %v543_v57 = vadd.f32 %v542_v29, %v539_v49  ;;  %v570_v59 = vadd.f32 %v569_v43, %v566_v50  ;;  %v577_v60 = vmul.f32 %v1490_v32, %v576_v46  ;;  %s1927_s19 = sld [smem:[#allocation2 + $0xb1]] }
  0x7b   :  { %v581_v61 = vmul.f32 %v1510_v42, %v580_v47  ;;  %v1851_v63 = vpop.eup %1151  ;;  %v515_v0 = vadd.f32 %v514_v20, %v512_v48  ;;  %v585_v2 = vmul.f32 %v1546_v62, %v584_v52  ;;  %v592_v3 = vstv %s1811_s20  ;;  %s1932_s20 = sld [smem:[#allocation2 + $0xab]] }
  0x7c   :  { %v604_v4 = vstv %s1813_s21  ;;  %v547_v5 = vadd.f32 %v546_v36, %v543_v57  ;;  %v574_v7 = vadd.f32 %v573_v45, %v570_v59  ;;  %v589_v8 = vmul.f32 %v1566_v17, %v588_v55  ;;  %s1934_s21 = sld [smem:[#allocation2 + $0xb2]] }
  0x7d   :  { %v596_v9 = vstv %s1817_s22  ;;  %v605_v10 = vmul.f32 %v1463_v13, %v604_v4  ;;  %v607_v11 = vstv %s1819_s23  ;;  %v611_v12 = vstv %s1825_s24  ;;  %s1937_s22 = sld [smem:[#allocation2 + $0xb6]]  ;;  %s1945_s23 = sld [smem:[#allocation2 + $0xb7]] }
  0x7e   :  { %v615_v16 = vstv %s1827_s25  ;;  %v551_v19 = vadd.f32 %v550_v6, %v547_v5  ;;  %v578_v20 = vadd.f32 %v577_v60, %v574_v7  ;;  %v608_v21 = vmul.f32 %v1473_v18, %v607_v11  ;;  %s1947_s24 = sld [smem:[#allocation2 + $0xb8]]  ;;  %s1954_s25 = sld [smem:[#allocation2 + $0xb9]] }
  0x7f   :  { %v612_v22 = vmul.f32 %v1477_v23, %v611_v12  ;;  %v593_v24 = vmul.f32 %v1584_v35, %v592_v3  ;;  %v616_v25 = vmul.f32 %v1482_v28, %v615_v16  ;;  %v619_v26 = vstv %s1835_s26  ;;  %s1958_s26 = sld [smem:[#allocation2 + $0xb3]] }
  0x80   :  { %v623_v27 = vstv %s1837_s27  ;;  %v555_v29 = vadd.f32 %v554_v53, %v551_v19  ;;  %v582_v15 = vadd.f32 %v581_v61, %v578_v20  ;;  %v609_v30 = vadd.f32 %v608_v21, %v605_v10  ;;  %s1960_s27 = sld [smem:[#allocation2 + $0xba]] }
  0x81   :  { %v627_v31 = vstv %s1840_s28  ;;  %1155 = vtanh.f32 %v515_v0  ;;  %v597_v33 = vmul.f32 %v1603_v44, %v596_v9  ;;  %v600_v36 = vstv %s1845_s29  ;;  %s1966_s28 = sld [smem:[#allocation2 + $0xbb]]  ;;  %s1968_s29 = sld [smem:[#allocation2 + $0xbc]] }
  0x82   :  { %v631_v37 = vstv %s1847_s0  ;;  %v586_v51 = vadd.f32 %v585_v2, %v582_v15  ;;  %v613_v38 = vadd.f32 %v612_v22, %v609_v30  ;;  %v620_v56 = vmul.f32 %v1490_v32, %v619_v26  ;;  %s1971_s0 = sld [smem:[#allocation2 + $0xb4]] }
  0x83   :  { %v624_v40 = vmul.f32 %v1510_v42, %v623_v27  ;;  %v1894_v41 = vpop.eup %1153  ;;  %v558_v1 = vadd.f32 %v557_v54, %v555_v29  ;;  %v628_v39 = vmul.f32 %v1546_v62, %v627_v31  ;;  %v635_v43 = vstv %s1856_s30  ;;  %s1973_s30 = sld [smem:[#allocation2 + $0xb5]] }
  0x84   :  { %v647_v6 = vstv %s1858_s3  ;;  %v590_v45 = vadd.f32 %v589_v8, %v586_v51  ;;  %v617_v46 = vadd.f32 %v616_v25, %v613_v38  ;;  %v632_v47 = vmul.f32 %v1566_v17, %v631_v37  ;;  %s1981_s3 = sld [smem:[#allocation2 + $0xd4]] }
  0x85   :  { %v639_v48 = vstv %s1862_s4  ;;  %v648_v49 = vmul.f32 %v1463_v13, %v647_v6  ;;  %v650_v50 = vstv %s1864_s5  ;;  %v654_v52 = vstv %s1870_s6  ;;  %s1984_s4 = sld [smem:[#allocation2 + $0xbd]]  ;;  %s1986_s5 = sld [smem:[#allocation2 + $0xc0]] }
  0x86   :  { %v658_v53 = vstv %s1872_s7  ;;  %v594_v54 = vadd.f32 %v593_v24, %v590_v45  ;;  %v621_v55 = vadd.f32 %v620_v56, %v617_v46  ;;  %v651_v57 = vmul.f32 %v1473_v18, %v650_v50  ;;  %s1992_s6 = sld [smem:[#allocation2 + $0xc1]]  ;;  %s1994_s7 = sld [smem:[#allocation2 + $0xc2]] }
  0x87   :  { %v655_v59 = vmul.f32 %v1477_v23, %v654_v52  ;;  %1157 = vtanh.f32 %v558_v1  ;;  %v659_v60 = vmul.f32 %v1482_v28, %v658_v53  ;;  %v662_v13 = vstv %s1880_s8  ;;  %s2001_s8 = sld [smem:[#allocation2 + $0xc3]] }
  0x88   :  { %v666_v61 = vstv %s1882_s1  ;;  %v598_v0 = vadd.f32 %v597_v33, %v594_v54  ;;  %v625_v2 = vadd.f32 %v624_v40, %v621_v55  ;;  %v652_v3 = vadd.f32 %v651_v57, %v648_v49  ;;  %s2003_s1 = sld [smem:[#allocation2 + $0xc4]] }
  0x89   :  { %v670_v4 = vstv %s1885_s10  ;;  %v636_v18 = vmul.f32 %v1584_v35, %v635_v43  ;;  %v640_v23 = vmul.f32 %v1603_v44, %v639_v48  ;;  %v663_v5 = vmul.f32 %v1490_v32, %v662_v13  ;;  %s2009_s10 = sld [smem:[#allocation2 + $0xbe]] }
  0x8a   :  { %v601_v28 = vadd.f32 %v600_v36, %v598_v0  ;;  %v629_v7 = vadd.f32 %v628_v39, %v625_v2  ;;  %v656_v8 = vadd.f32 %v655_v59, %v652_v3  ;;  %v667_v9 = vmul.f32 %v1510_v42, %v666_v61 }
  0x8b   :  { %v1939_v10 = vpop.eup %1155  ;;  %v671_v11 = vmul.f32 %v1546_v62, %v670_v4  ;;  %v674_v32 = vstv %s1892_s12  ;;  %v678_v12 = vstv %s1899_s13  ;;  %v690_v16 = vstv %s1901_s15  ;;  %s2011_s12 = sld [smem:[#allocation2 + $0xc5]]  ;;  %s2016_s13 = sld [smem:[#allocation2 + $0xbf]] }
  0x8c   :  { %1159 = vtanh.f32 %v601_v28  ;;  %v633_v19 = vadd.f32 %v632_v47, %v629_v7  ;;  %v660_v20 = vadd.f32 %v659_v60, %v656_v8  ;;  %v682_v42 = vstv %s1905_s9  ;;  %s2018_s15 = sld [smem:[#allocation2 + $0xd5]]  ;;  %s2022_s9 = sld [smem:[#allocation2 + $0xc6]] }
  0x8d   :  { %v691_v21 = vmul.f32 %v1722_v14, %v690_v16  ;;  %v693_v22 = vstv %s1907_s11  ;;  %v697_v24 = vstv %s1913_s14  ;;  %v701_v25 = vstv %s1915_s16  ;;  %s2027_s11 = sld [smem:[#allocation2 + $0xc7]]  ;;  %s2032_s14 = sld [smem:[#allocation2 + $0xc8]] }
  0x8e   :  { %v637_v62 = vadd.f32 %v636_v18, %v633_v19  ;;  %v664_v26 = vadd.f32 %v663_v5, %v660_v20  ;;  %v694_v27 = vmul.f32 %v1751_v34, %v693_v22  ;;  %v698_v29 = vmul.f32 %v1776_v58, %v697_v24  ;;  %s2034_s16 = sld [smem:[#allocation2 + $0xca]] }
  0x8f   :  { %v643_v15 = vstv %s1919_s17  ;;  %v675_v30 = vmul.f32 %v1566_v17, %v674_v32  ;;  %v702_v31 = vmul.f32 %v1851_v63, %v701_v25  ;;  %v705_v33 = vstv %s1924_s18  ;;  %s2039_s17 = sld [smem:[#allocation2 + $0xcb]]  ;;  %s2041_s18 = sld [smem:[#allocation2 + $0xcc]] }
  0x90   :  { %v641_v36 = vadd.f32 %v640_v23, %v637_v62  ;;  %v668_v37 = vadd.f32 %v667_v9, %v664_v26  ;;  %v695_v51 = vadd.f32 %v694_v27, %v691_v21  ;;  %v709_v38 = vstv %s1927_s19  ;;  %s2048_s19 = sld [smem:[#allocation2 + $0xcd]] }
  0x91   :  { %v1975_v56 = vpop.eup %1157  ;;  %v679_v17 = vmul.f32 %v1584_v35, %v678_v12  ;;  %v683_v40 = vmul.f32 %v1603_v44, %v682_v42  ;;  %v686_v1 = vstv %s1932_s20  ;;  %v713_v39 = vstv %s1934_s21  ;;  %s2050_s20 = sld [smem:[#allocation2 + $0xce]]  ;;  %s2060_s21 = sld [smem:[#allocation2 + $0xc9]] }
  0x92   :  { %v644_v43 = vadd.f32 %v643_v15, %v641_v36  ;;  %v672_v6 = vadd.f32 %v671_v11, %v668_v37  ;;  %v699_v45 = vadd.f32 %v698_v29, %v695_v51  ;;  %v706_v46 = vmul.f32 %v1894_v41, %v705_v33 }
  0x93   :  { %v710_v47 = vmul.f32 %v1939_v10, %v709_v38  ;;  %v733_v48 = vstv %s1937_s22  ;;  %v736_v35 = vstv %s1945_s23  ;;  %v740_v49 = vstv %s1947_s24  ;;  %s2062_s22 = sld [smem:[#allocation2 + $0xcf]]  ;;  %s2069_s23 = sld [smem:[#allocation2 + $0xd0]] }
  0x94   :  { %1161 = vtanh.f32 %v644_v43  ;;  %v676_v44 = vadd.f32 %v675_v30, %v672_v6  ;;  %v703_v50 = vadd.f32 %v702_v31, %v699_v45  ;;  %v734_v52 = vmul.f32 %v1722_v14, %v733_v48  ;;  %s2077_s24 = sld [smem:[#allocation2 + $0xd1]] }
  0x95   :  { %v714_v53 = vmul.f32 %v1975_v56, %v713_v39  ;;  %v737_v54 = vmul.f32 %v1751_v34, %v736_v35  ;;  %v741_v55 = vmul.f32 %v1776_v58, %v740_v49  ;;  %v744_v57 = vstv %s1954_s25  ;;  %s2082_s25 = sld [smem:[#allocation2 + $0xd6]] }
  0x96   :  { %v2005_v59 = vpop.eup %1159  ;;  %v680_v60 = vadd.f32 %v679_v17, %v676_v44  ;;  %v707_v13 = vadd.f32 %v706_v46, %v703_v50  ;;  %v717_v61 = vstv %s1958_s26  ;;  %v748_v0 = vstv %s1960_s27  ;;  %s2086_s26 = sld [smem:[#allocation2 + $0xd2]]  ;;  %s2094_s27 = sld [smem:[#allocation2 + $0xd3]] }
  0x97   :  { %v738_v2 = vadd.f32 %v737_v54, %v734_v52  ;;  %v745_v3 = vmul.f32 %v1851_v63, %v744_v57  ;;  %v752_v4 = vstv %s1966_s28  ;;  %v756_v18 = vstv %s1968_s29  ;;  %s1109_s28 = sld [smem:[#allocation2 + $0xd7]]  ;;  %s1110_s29 = sld [smem:[#allocation2 + $0xd8]] }
  0x98   :  { %v684_v23 = vadd.f32 %v683_v40, %v680_v60  ;;  %v711_v5 = vadd.f32 %v710_v47, %v707_v13  ;;  %v721_v28 = vstv %s1971_s0  ;;  %v725_v7 = vstv %s1973_s30  ;;  %s1111_s0 = sld [smem:[#allocation2 + $0xd9]]  ;;  %s1112_s30 = sld [smem:[#allocation2 + $0xda]] }
  0x99   :  { %v718_v8 = vmul.f32 %v2005_v59, %v717_v61  ;;  %v729_v9 = vstv %s1981_s3  ;;  %v742_v11 = vadd.f32 %v741_v55, %v738_v2  ;;  %v749_v32 = vmul.f32 %v1894_v41, %v748_v0  ;;  %s1113_s3 = sld [smem:[#allocation2 + $0xdb]] }
  0x9a   :  { %v687_v12 = vadd.f32 %v686_v1, %v684_v23  ;;  %v753_v16 = vmul.f32 %v1939_v10, %v752_v4  ;;  %v757_v19 = vmul.f32 %v1975_v56, %v756_v18  ;;  %v760_v20 = vstv %s1984_s4  ;;  %s1114_s4 = sld [smem:[#allocation2 + $0xdc]] }
  0x9b   :  { %v746_v42 = vadd.f32 %v745_v3, %v742_v11  ;;  %v776_v21 = vstv %s1986_s5  ;;  %v779_v22 = vstv %s1992_s6  ;;  %v783_v24 = vstv %s1994_s7  ;;  %s1210_s5 = smov [#allocation5]  }
  0x9c   :  { %1163 = vtanh.f32 %v687_v12  ;;  %v715_v25 = vadd.f32 %v714_v53, %v711_v5  ;;  %v777_v62 = vmul.f32 %v1722_v14, %v776_v21  ;;  %v780_v26 = vmul.f32 %v1751_v34, %v779_v22  ;;  %s886_s6 = sshll.u32 %s1210_s5, 4  ;;  %s887_s6 = int_to_ptr.vmem [resolvable:$true] %s886_s6 }
  0x9d   :  { %v750_v27 = vadd.f32 %v749_v32, %v746_v42  ;;  %v784_v29 = vmul.f32 %v1776_v58, %v783_v24  ;;  %v787_v15 = vstv %s2001_s8  ;;  %v791_v30 = vstv %s2003_s1  ;;  %s1183_s7 = scalar_lea.vmem %s887_s6, 16  ;;  %s1187_s8 = scalar_lea.vmem %s887_s6, 32 }
  0x9e   :  { %v2052_v31 = vpop.eup %1161  ;;  %v764_v33 = vstv %s2009_s10  ;;  %v781_v36 = vadd.f32 %v780_v26, %v777_v62  ;;  %v788_v37 = vmul.f32 %v1851_v63, %v787_v15  ;;  %v795_v51 = vstv %s2011_s12  ;;  %p1184_p3 = scmp.ne.s32.totalorder %s887_s6, %s1183_s7  ;;  %p1188_p4 = scmp.lt.s32.totalorder %s887_s6, %s887_s6 }
  0x9f   :  { %v754_v38 = vadd.f32 %v753_v16, %v750_v27  ;;  %v761_v17 = vmul.f32 %v2005_v59, %v760_v20  ;;  %v768_v40 = vstv %s2016_s13  ;;  %v772_v1 = vstv %s2018_s15  ;;  %p1189_p5 = scmp.lt.s32.totalorder %s1187_s8, %s1183_s7 }
  0xa0   :  { %v719_v39 = vadd.f32 %v718_v8, %v715_v25  ;;  %v785_v43 = vadd.f32 %v784_v29, %v781_v36  ;;  %v792_v6 = vmul.f32 %v1894_v41, %v791_v30  ;;  %v799_v45 = vstv %s2022_s9 }
  0xa1   :  { %v722_v46 = vmul.f32 %v2052_v31, %v721_v28  ;;  %v758_v47 = vadd.f32 %v757_v19, %v754_v38  ;;  %v765_v48 = vmul.f32 %v2052_v31, %v764_v33  ;;  %v796_v35 = vmul.f32 %v1939_v10, %v795_v51  ;;  %p1190_p6 = por %p1189_p5, %p1188_p4 }
  0xa2   :  { %v789_v49 = vadd.f32 %v788_v37, %v785_v43  ;;  %v800_v44 = vmul.f32 %v1975_v56, %v799_v45  ;;  %v803_v50 = vstv %s2027_s11  ;;  %v807_v52 = vstv %s2032_s14 }
  0xa3   :  { %v762_v53 = vadd.f32 %v761_v17, %v758_v47  ;;  %v819_v54 = vstv %s2034_s16  ;;  %v822_v55 = vstv %s2039_s17  ;;  %v826_v57 = vstv %s2041_s18  ;;  %p1191_p7 = pnand %p1190_p6, %p1184_p3 }
  0xa4   :  { %v793_v60 = vadd.f32 %v792_v6, %v789_v49  ;;  %v820_v13 = vmul.f32 %v1722_v14, %v819_v54  ;;  %v823_v61 = vmul.f32 %v1751_v34, %v822_v55  ;;  %v827_v0 = vmul.f32 %v1776_v58, %v826_v57 }
  0xa5   :  { %v723_v2 = vadd.f32 %v722_v46, %v719_v39  ;;  %v766_v3 = vadd.f32 %v765_v48, %v762_v53  ;;  %v830_v4 = vstv %s2048_s19  ;;  %v834_v18 = vstv %s2050_s20 }
  0xa6   :  { %v1164_v23 = vpop.eup %1163  ;;  %v797_v5 = vadd.f32 %v796_v35, %v793_v60  ;;  %v804_v28 = vmul.f32 %v2005_v59, %v803_v50  ;;  %v824_v14 = vadd.f32 %v823_v61, %v820_v13  ;;  %v831_v8 = vmul.f32 %v1851_v63, %v830_v4 }
  0xa7   :  { %v726_v34 = vmul.f32 %v1164_v23, %v725_v7  ;;  %v769_v58 = vmul.f32 %v1164_v23, %v768_v40  ;;  %v811_v11 = vstv %s2060_s21  ;;  %v838_v32 = vstv %s2062_s22 }
  0xa8   :  { %v801_v12 = vadd.f32 %v800_v44, %v797_v5  ;;  %v808_v16 = vmul.f32 %v2052_v31, %v807_v52  ;;  %v828_v19 = vadd.f32 %v827_v0, %v824_v14  ;;  %v835_v20 = vmul.f32 %v1894_v41, %v834_v18 }
  0xa9   :  { %v727_v42 = vadd.f32 %v726_v34, %v723_v2  ;;  %v770_v21 = vadd.f32 %v769_v58, %v766_v3  ;;  %v842_v63 = vstv %s2069_s23  ;;  %v812_v7 = vmul.f32 %v1164_v23, %v811_v11 }
  0xaa   :  { %v805_v22 = vadd.f32 %v804_v28, %v801_v12  ;;  %v832_v24 = vadd.f32 %v831_v8, %v828_v19  ;;  %v839_v25 = vmul.f32 %v1939_v10, %v838_v32  ;;  %v846_v27 = vstv %s2077_s24 }
  0xab   :  { %v730_v62 = vadd.f32 %v729_v9, %v727_v42  ;;  %v773_v26 = vadd.f32 %v772_v1, %v770_v21  ;;  %v843_v30 = vmul.f32 %v1975_v56, %v842_v63  ;;  %v815_v41 = vstv %s2082_s25 }
  0xac   :  { %v809_v29 = vadd.f32 %v808_v16, %v805_v22  ;;  %v836_v15 = vadd.f32 %v835_v20, %v832_v24  ;;  %v850_v33 = vstv %s2086_s26  ;;  %v847_v51 = vmul.f32 %v2005_v59, %v846_v27 }
  0xad   :  { %1165 = vtanh.f32 %v730_v62  ;;  %v854_v38 = vstv %s2094_s27  ;;  %v851_v9 = vmul.f32 %v2052_v31, %v850_v33  ;;  %v858_v39 = vstv %s1109_s28 }
  0xae   :  { %1167 = vtanh.f32 %v773_v26  ;;  %v813_v36 = vadd.f32 %v812_v7, %v809_v29  ;;  %v840_v37 = vadd.f32 %v839_v25, %v836_v15  ;;  %v855_v1 = vmul.f32 %v1164_v23, %v854_v38 }
  0xaf   :  { %v862_v47 = vstv %s1110_s29  ;;  %v865_v48 = vstv %s1111_s0  ;;  %v869_v31 = vstv %s1112_s30  ;;  %v873_v52 = vstv %s1113_s3 }
  0xb0   :  { %v816_v17 = vadd.f32 %v815_v41, %v813_v36  ;;  %v844_v10 = vadd.f32 %v843_v30, %v840_v37  ;;  %v877_v57 = vstv %s1114_s4 }
  0xb2   :  { %1169 = vtanh.f32 %v816_v17  ;;  %v848_v40 = vadd.f32 %v847_v51, %v844_v10 }
  0xb4   :  { %v852_v56 = vadd.f32 %v851_v9, %v848_v40 }
  0xb6   :  { %v856_v43 = vadd.f32 %v855_v1, %v852_v56 }
  0xb7   :  { %v1166_v6 = vpop.eup %1165 }
  0xb8   :  { %v1168_v45 = vpop.eup %1167  ;;  %v859_v46 = vadd.f32 %v858_v39, %v856_v43  ;;  %v863_v59 = vmul.f32 %v1166_v6, %v862_v47 }
  0xb9   :  { %v866_v35 = vmul.f32 %v1168_v45, %v865_v48 }
  0xba   :  { %1171 = vtanh.f32 %v859_v46 }
  0xbb   :  { %v867_v44 = vadd.f32 %v866_v35, %v863_v59 }
  0xbc   :  { %v1170_v49 = vpop.eup %1169 }
  0xbd   :  { %v870_v50 = vmul.f32 %v1170_v49, %v869_v31 }
  0xbf   :  { %v871_v53 = vadd.f32 %v870_v50, %v867_v44 }
  0xc4   :  { %v1172_v54 = vpop.eup %1171 }
  0xc5   :  { %v874_v55 = vmul.f32 %v1172_v54, %v873_v52 }
  0xc7   :  { %v875_v60 = vadd.f32 %v874_v55, %v871_v53 }
  0xc9   :  { %v878_v13 = vadd.f32 %v877_v57, %v875_v60 }
  0xcb   :  { %879 = vst [vmem:[#allocation5] sm:$0x1] %v878_v13 }
  0xcc   :  { %1194 = shalt.err (!%p1191_p7)
}
  0xcd   :  { %s1195_s12 = scalar_lea.hbm %s2123_s2, 16 }
  0xce   :  { %p1196_p8 = scmp.ne.s32.totalorder %s2123_s2, %s1195_s12  ;;  %p1199_p9 = scmp.lt.u32.totalorder %s1195_s12, %s2123_s2 }
  0xd0   :  { %p1201_p10 = pnand %p1199_p9, %p1196_p8 }
  0xd2   :  { %1204 = shalt.err (!%p1201_p10)
}
  0xd3   :  { %889 = dma.vmem_to_hbm [thread:$0]  %s887_s6, 16, %s2123_s2, [#allocation3]  }
  0xd4   :  { %1207 = dma.done.wait [#allocation3], 16  }
  0xd5   :  { %1208 = vsyncadd [#allocation3], 4294967280 }
  0xd6   :  { %893 = vsyncpa [#allocation3], 1 }
  0xd7   :  { %894 = vsyncpa [#allocation4], 1 }

</bundles_post_ra>
